<compile_context>
chip_gen: v7x
topology: tpu7x:2x2x1
jax: 0.10.0
libtpu: 0.0.40
codegen_flags: <defaults>
</compile_context>

<pallas_src>
import functools

import jax
import jax.numpy as jnp
from jax import lax
from jax.experimental import pallas as pl
from jax.experimental.pallas import tpu as pltpu
from jax.scipy.linalg import block_diag

NUM_HEADS = 4
ATT_DIMS = [64, 32, 16, 1]          # SpatialAttentionBlock(in_features, [64, 32, 16, 1])
OUT_DIM_HEADS = [3, 4, 3, 1]        # implied by the asserts in forward()
TOTAL_OUT = sum(OUT_DIM_HEADS)      # 11


# --------------------------------------------------------------------------
# Kernel 1: spatial-attention stack + gated global-average-pool partial sums.
# --------------------------------------------------------------------------
def attention_pool_kernel(x_ref, w1_ref, b1_ref, w2_ref, b2_ref,
                          w3_ref, b3_ref, w4_ref, b4_ref,
                          part_ref, acc_ref):
    s_idx = pl.program_id(2)

    @pl.when(s_idx == 0)
    def _init():
        acc_ref[...] = jnp.zeros_like(acc_ref)

    x = x_ref[0].astype(jnp.bfloat16)                          # (C, s_tile)

    # TODO(synk): SpatialAttentionBlock definition is not in the source; this
    # is the canonical 1x1-conv spatial-attention stack (ReLU x3, sigmoid gate
    # applied to the features before the average pool).
    a = jax.nn.relu(jnp.dot(w1_ref[...], x,
                            preferred_element_type=jnp.float32) + b1_ref[...])
    a = jax.nn.relu(jnp.dot(w2_ref[...], a.astype(jnp.bfloat16),
                            preferred_element_type=jnp.float32) + b2_ref[...])
    a = jax.nn.relu(jnp.dot(w3_ref[...], a.astype(jnp.bfloat16),
                            preferred_element_type=jnp.float32) + b3_ref[...])
    g = jax.nn.sigmoid(jnp.dot(w4_ref[...], a.astype(jnp.bfloat16),
                               preferred_element_type=jnp.float32) + b4_ref[...])
    # g: (NUM_HEADS, s_tile) per-head spatial gates.

    # Gated pool partial sums as an MXU contraction over the spatial tile:
    #   acc[h, c] += sum_s g[h, s] * x[c, s]
    acc_ref[...] += lax.dot_general(
        g.astype(jnp.bfloat16), x,
        dimension_numbers=(((1,), (1,)), ((), ())),
        preferred_element_type=jnp.float32)                    # (NUM_HEADS, C)

    @pl.when(s_idx == pl.num_programs(2) - 1)
    def _store():
        part_ref[...] = acc_ref[...].reshape(part_ref.shape)


# --------------------------------------------------------------------------
# Kernel 2: post-pool FC heads (Linear -> Swish -> [Dropout=id] -> Linear).
# wfc1 is streamed over C-chunks (grid axis k) so it is never fully resident.
# --------------------------------------------------------------------------
def fc_heads_kernel(pooled_ref, wfc1_ref, bfc1_ref, wfc2_ref, bfc2_ref,
                    out_ref, z_ref):
    k = pl.program_id(0)

    @pl.when(k == 0)
    def _init():
        z_ref[...] = jnp.zeros_like(z_ref)

    p = pooled_ref[...].astype(jnp.bfloat16)                   # (H, B, ck)
    # FC1 partial: z[h, b, o] += sum_k pooled[h, b, k] * wfc1[h, o, k]
    z_ref[...] += lax.dot_general(
        p, wfc1_ref[...],
        dimension_numbers=(((2,), (2,)), ((0,), (0,))),
        preferred_element_type=jnp.float32)                    # (H, B, C)

    @pl.when(k == pl.num_programs(0) - 1)
    def _finalize():
        z = z_ref[...] + bfc1_ref[...]                         # (H, B, C)
        z = z * jax.nn.sigmoid(z)      # Swish; Dropout(p=0.3) is identity in eval
        hd = lax.dot_general(
            z.astype(jnp.bfloat16), wfc2_ref[...],
            dimension_numbers=(((2,), (2,)), ((0,), (0,))),
            preferred_element_type=jnp.float32)                # (H, B, TOTAL_OUT)
        # Each head only populates its own column slot -> sum over heads == concat.
        out_ref[...] = (jnp.sum(hd, axis=0) + bfc2_ref[...]).astype(out_ref.dtype)


# --------------------------------------------------------------------------
# Parameter construction / packing (PyTorch (out, in) layout everywhere).
# --------------------------------------------------------------------------
def init_head_params(key, in_features, out_dim):
    """Deterministic synthetic weights for one head (PyTorch (out, in) layout)."""
    keys = jax.random.split(key, 12)
    dims = [in_features] + ATT_DIMS
    att_w, att_b = [], []
    for i in range(4):
        att_w.append(jax.random.normal(keys[2 * i], (dims[i + 1], dims[i]),
                                       jnp.float32) * 0.2)
        att_b.append(jax.random.normal(keys[2 * i + 1], (dims[i + 1],),
                                       jnp.float32) * 0.05)
    wfc1 = jax.random.normal(keys[8], (in_features, in_features), jnp.float32) * 0.2
    bfc1 = jax.random.normal(keys[9], (in_features,), jnp.float32) * 0.05
    wfc2 = jax.random.normal(keys[10], (out_dim, in_features), jnp.float32) * 0.2
    bfc2 = jax.random.normal(keys[11], (out_dim,), jnp.float32) * 0.05
    return dict(att_w=att_w, att_b=att_b, wfc1=wfc1, bfc1=bfc1,
                wfc2=wfc2, bfc2=bfc2)


def pack_head_params(heads_params):
    """Pack the 4 heads' weights for the two kernels (bf16 matmul operands)."""
    bf16 = lambda a: a.astype(jnp.bfloat16)
    cat_b = lambda i: jnp.concatenate(
        [p['att_b'][i] for p in heads_params])[:, None]        # (out, 1)
    # Attention layer 1: row-concat -> (4*64, C).  Layers 2-4: block-diagonal
    # so the heads stay independent while staying lane/sublane-dense.
    w1 = jnp.concatenate([p['att_w'][0] for p in heads_params], axis=0)  # (256, C)
    w2 = block_diag(*[p['att_w'][1] for p in heads_params])             # (128, 256)
    w3 = block_diag(*[p['att_w'][2] for p in heads_params])             # (64, 128)
    w4 = block_diag(*[p['att_w'][3] for p in heads_params])             # (4, 64)
    att_packed = [bf16(w1), cat_b(0), bf16(w2), cat_b(1),
                  bf16(w3), cat_b(2), bf16(w4), cat_b(3)]

    C = heads_params[0]['wfc1'].shape[0]
    wfc1 = jnp.stack([p['wfc1'] for p in heads_params])                 # (4, C, C)
    bfc1 = jnp.stack([p['bfc1'] for p in heads_params])[:, None, :]     # (4, 1, C)
    # FC2: each head scattered into its concatenation slot of the 11-wide output.
    wfc2 = jnp.zeros((NUM_HEADS, TOTAL_OUT, C), jnp.float32)
    bfc2 = jnp.zeros((1, TOTAL_OUT), jnp.float32)
    off = 0
    for h, p in enumerate(heads_params):
        d = p['wfc2'].shape[0]
        wfc2 = wfc2.at[h, off:off + d, :].set(p['wfc2'])
        bfc2 = bfc2.at[0, off:off + d].set(p['bfc2'])
        off += d
    fc_packed = [bf16(wfc1), bfc1, bf16(wfc2), bfc2]
    return att_packed, fc_packed


# --------------------------------------------------------------------------
# Wrapper.
# --------------------------------------------------------------------------
def _vmem_limit_bytes():
    """Generation-aware VMEM limit: ~80% of physical (64 MiB v7x, 128 v5e/v6e)."""
    try:
        cap = pltpu.get_tpu_info().vmem_capacity_bytes
    except Exception:
        cap = 64 * 1024 * 1024
    return int(cap * 0.8)


def _pick_s_tile(S, cap=1024):
    """Full S when small; else the largest 128-aligned divisor of S (<= cap)."""
    if S <= cap:
        return S
    for t in range(cap, 127, -128):
        if S % t == 0:
            return t
    return cap          # no aligned divisor: S is zero-padded in the wrapper


def _pick_c_tile(C, cap=512):
    """FC1 contraction chunk so the streamed wfc1 blocks stay small at real C."""
    if C <= cap:
        return C
    for t in range(cap, 127, -128):
        if C % t == 0:
            return t
    return C


@functools.partial(jax.jit, static_argnames=("s_tile",))
def custom_model_forward(x_nchw, att_packed, fc_packed, s_tile=None):
    """Multi-head forward on backbone features.

    x_nchw: (B, C, H, W) backbone feature map (PyTorch NCHW).
    Returns: (B, 11) concatenated head logits.
    """
    B, C, H, W = x_nchw.shape
    S = H * W
    # NCHW -> (B, C, S) is a *free* reshape: no transpose / no cast HBM pass.
    x = x_nchw.reshape(B, C, S)

    if s_tile is None:
        s_tile = _pick_s_tile(S)
    s_pad = pl.cdiv(S, s_tile) * s_tile
    assert s_tile == s_pad or s_tile % 128 == 0, (S, s_tile)
    if s_pad != S:
        # Zero columns contribute exactly 0 to the gated sum; mean uses true S.
        x = jnp.pad(x, ((0, 0), (0, 0), (0, s_pad - S)))
    num_s = s_pad // s_tile
    # Small-batch inference: split the S range across v7x's two TensorCores.
    s_split = 2 if (B == 1 and num_s % 2 == 0) else 1
    n_inner = num_s // s_split

    vmem_limit = _vmem_limit_bytes()
    a1d, a2d, a3d, a4d = (NUM_HEADS * d for d in ATT_DIMS)     # 256, 128, 64, 4

    def wspec(shape):
        # Constant index map -> nothing to prefetch -> single-buffer the weight.
        return pl.BlockSpec(shape, lambda b, c, s: (0, 0),
                            pipeline_mode=pl.Buffered(1))

    partials = pl.pallas_call(
        attention_pool_kernel,
        out_shape=jax.ShapeDtypeStruct((B, s_split, NUM_HEADS, C), jnp.float32),
        grid_spec=pltpu.PrefetchScalarGridSpec(
            num_scalar_prefetch=0,
            grid=(B, s_split, n_inner),
            in_specs=[
                pl.BlockSpec((1, C, s_tile),
                             lambda b, c, s: (b, 0, c * n_inner + s)),
                wspec((a1d, C)), wspec((a1d, 1)),
                wspec((a2d, a1d)), wspec((a2d, 1)),
                wspec((a3d, a2d)), wspec((a3d, 1)),
                wspec((a4d, a3d)), wspec((a4d, 1)),
            ],
            out_specs=pl.BlockSpec((1, 1, NUM_HEADS, C),
                                   lambda b, c, s: (b, c, 0, 0)),
            scratch_shapes=[pltpu.VMEM((NUM_HEADS, C), jnp.float32)],
        ),
        compiler_params=pltpu.CompilerParams(
            dimension_semantics=("parallel", "parallel", "arbitrary"),
            vmem_limit_bytes=vmem_limit,
        ),
    )(x, *att_packed)

    # Tiny epilogue in XLA: combine core partials, true-S mean, head-major layout.
    pooled = jnp.transpose(partials.sum(axis=1) * (1.0 / S), (1, 0, 2))  # (4, B, C)

    ck = _pick_c_tile(C)
    assert C % ck == 0, (C, ck)
    num_k = C // ck

    def cspec(shape):
        return pl.BlockSpec(shape, lambda k: (0,) * len(shape),
                            pipeline_mode=pl.Buffered(1))

    out = pl.pallas_call(
        fc_heads_kernel,
        out_shape=jax.ShapeDtypeStruct((B, TOTAL_OUT), jnp.float32),
        grid_spec=pltpu.PrefetchScalarGridSpec(
            num_scalar_prefetch=0,
            grid=(num_k,),
            in_specs=[
                pl.BlockSpec((NUM_HEADS, B, ck), lambda k: (0, 0, k)),   # pooled
                pl.BlockSpec((NUM_HEADS, C, ck), lambda k: (0, 0, k)),   # wfc1 streamed
                cspec((NUM_HEADS, 1, C)),                                # bfc1
                cspec((NUM_HEADS, TOTAL_OUT, C)),                        # wfc2 packed
                cspec((1, TOTAL_OUT)),                                   # bfc2 packed
            ],
            out_specs=pl.BlockSpec((B, TOTAL_OUT), lambda k: (0, 0)),
            scratch_shapes=[pltpu.VMEM((NUM_HEADS, B, C), jnp.float32)],
        ),
        compiler_params=pltpu.CompilerParams(
            dimension_semantics=("arbitrary",),
            vmem_limit_bytes=vmem_limit,
        ),
    )(pooled, *fc_packed)
    return out


# --------------------------------------------------------------------------
# Pure-JAX f32 reference of the 4 heads (eval mode).
# --------------------------------------------------------------------------
def reference_forward(x_nchw, heads_params):
    B, C, H, W = x_nchw.shape
    x = jnp.transpose(x_nchw, (0, 2, 3, 1)).reshape(B, H * W, C)
    outs = []
    for p in heads_params:
        a = x
        for i in range(4):
            a = jnp.einsum('bsf,of->bso', a, p['att_w'][i]) + p['att_b'][i]
            a = jax.nn.relu(a) if i < 3 else jax.nn.sigmoid(a)
        pooled = jnp.mean(x * a, axis=1)               # sigmoid gate, then avg-pool
        z = pooled @ p['wfc1'].T + p['bfc1']
        z = z * jax.nn.sigmoid(z)                      # Swish
        outs.append(z @ p['wfc2'].T + p['bfc2'])
    return jnp.concatenate(outs, axis=1)


if __name__ == "__main__":
    key = jax.random.PRNGKey(0)
    # C = backbone num_features (small synthetic; real backbones should use a
    # multiple of 128 to keep the MXU K dimension full).
    B, C, H, W = 2, 32, 16, 16

    k_in, k_params = jax.random.split(key)
    x = jax.random.normal(k_in, (B, C, H, W), jnp.float32)

    head_keys = jax.random.split(k_params, NUM_HEADS)
    heads_params = [init_head_params(hk, C, od)
                    for hk, od in zip(head_keys, OUT_DIM_HEADS)]
    att_packed, fc_packed = pack_head_params(heads_params)

    ref = reference_forward(x, heads_params)

    # s_tile=128 -> 2 spatial tiles: exercises the accumulate / pl.when path.
    out = jax.block_until_ready(
        custom_model_forward(x, att_packed, fc_packed, s_tile=128))
    assert out.shape == (B, TOTAL_OUT), out.shape
    assert bool(jnp.all(jnp.isfinite(out)))
    rel_err = float(jnp.max(jnp.abs(out - ref)) / (jnp.max(jnp.abs(ref)) + 1e-6))
    assert rel_err < 0.1, rel_err     # bf16 matmuls vs f32 reference

    # B=1 exercises the s_split=2 path (keeps v7x's 2nd TensorCore busy).
    out1 = jax.block_until_ready(
        custom_model_forward(x[:1], att_packed, fc_packed, s_tile=128))
    rel_err1 = float(jnp.max(jnp.abs(out1 - ref[:1])) /
                     (jnp.max(jnp.abs(ref[:1])) + 1e-6))
    assert rel_err1 < 0.1, rel_err1

    print("KERNEL_OK")
</pallas_src>

<mosaic_0001>
module attributes {stable_mosaic.version = 11 : i64} {
  func.func @attention_pool_kernel(%arg0: i32, %arg1: i32, %arg2: i32, %arg3: memref<1x32x128xf32, #tpu.memory_space<vmem>>, %arg4: memref<256x32xbf16, #tpu.memory_space<vmem>>, %arg5: memref<256x1xf32, #tpu.memory_space<vmem>>, %arg6: memref<128x256xbf16, #tpu.memory_space<vmem>>, %arg7: memref<128x1xf32, #tpu.memory_space<vmem>>, %arg8: memref<64x128xbf16, #tpu.memory_space<vmem>>, %arg9: memref<64x1xf32, #tpu.memory_space<vmem>>, %arg10: memref<4x64xbf16, #tpu.memory_space<vmem>>, %arg11: memref<4x1xf32, #tpu.memory_space<vmem>>, %arg12: memref<1x1x4x32xf32, #tpu.memory_space<vmem>>, %arg13: memref<4x32xf32, #tpu.memory_space<vmem>>) attributes {dimension_semantics = [#tpu.dimension_semantics<parallel>, #tpu.dimension_semantics<parallel>, #tpu.dimension_semantics<arbitrary>], iteration_bounds = array<i64: 2, 1, 2>, scalar_prefetch = 0 : i64, scratch_operands = 1 : i64, tpu.core_type = #tpu.core_type<tc>, window_params = [{transform_indices = @transform_0, window_bounds = array<i64: 1, 32, 128>}, {pipeline_mode = #tpu.pipeline_mode<synchronous>, transform_indices = @transform_1, window_bounds = array<i64: 256, 32>}, {pipeline_mode = #tpu.pipeline_mode<synchronous>, transform_indices = @transform_2, window_bounds = array<i64: 256, 1>}, {pipeline_mode = #tpu.pipeline_mode<synchronous>, transform_indices = @transform_3, window_bounds = array<i64: 128, 256>}, {pipeline_mode = #tpu.pipeline_mode<synchronous>, transform_indices = @transform_4, window_bounds = array<i64: 128, 1>}, {pipeline_mode = #tpu.pipeline_mode<synchronous>, transform_indices = @transform_5, window_bounds = array<i64: 64, 128>}, {pipeline_mode = #tpu.pipeline_mode<synchronous>, transform_indices = @transform_6, window_bounds = array<i64: 64, 1>}, {pipeline_mode = #tpu.pipeline_mode<synchronous>, transform_indices = @transform_7, window_bounds = array<i64: 4, 64>}, {pipeline_mode = #tpu.pipeline_mode<synchronous>, transform_indices = @transform_8, window_bounds = array<i64: 4, 1>}, {transform_indices = @transform_9, window_bounds = array<i64: 1, 1, 4, 32>}]} {
    %c0_i32 = arith.constant 0 : i32
    %0 = arith.cmpi eq, %arg2, %c0_i32 : i32
    %1 = arith.extui %0 : i1 to i32
    %c0_i32_0 = arith.constant 0 : i32
    %2 = arith.cmpi ne, %1, %c0_i32_0 : i32
    scf.if %2 {
      %cst_32 = arith.constant 0.000000e+00 : f32
      %48 = vector.broadcast %cst_32 : f32 to vector<4x32xf32>
      %c0_33 = arith.constant 0 : index
      %c0_34 = arith.constant 0 : index
      %49 = vector.load %arg13[%c0_33, %c0_34] : memref<4x32xf32, #tpu.memory_space<vmem>>, vector<4x32xf32>
      tpu.vector_store %arg13[%c0_33, %c0_34], %48 {strides = array<i32>} : memref<4x32xf32, #tpu.memory_space<vmem>>, vector<4x32xf32>,
    } else {
    }
    %c0 = arith.constant 0 : index
    %c0_1 = arith.constant 0 : index
    %c0_2 = arith.constant 0 : index
    %3 = vector.load %arg3[%c0, %c0_1, %c0_2] : memref<1x32x128xf32, #tpu.memory_space<vmem>>, vector<1x32x128xf32>
    %4 = vector.shape_cast %3 : vector<1x32x128xf32> to vector<32x128xf32>
    %5 = arith.truncf %4 : vector<32x128xf32> to vector<32x128xbf16>
    %c0_3 = arith.constant 0 : index
    %c0_4 = arith.constant 0 : index
    %6 = vector.load %arg4[%c0_3, %c0_4] : memref<256x32xbf16, #tpu.memory_space<vmem>>, vector<256x32xbf16>
    %cst = arith.constant dense<0.000000e+00> : vector<256x128xf32>
    %7 = tpu.matmul %6, %5, %cst {dimension_numbers = #tpu.dot_dimension_numbers<[1], [0], [0], [1], [0, 0, 1, 1], [], []>} : vector<256x32xbf16>, vector<32x128xbf16>, vector<256x128xf32> -> vector<256x128xf32>
    %c0_5 = arith.constant 0 : index
    %c0_6 = arith.constant 0 : index
    %8 = vector.load %arg5[%c0_5, %c0_6] : memref<256x1xf32, #tpu.memory_space<vmem>>, vector<256x1xf32>
    %9 = vector.broadcast %8 : vector<256x1xf32> to vector<256x128xf32>
    %10 = arith.addf %7, %9 : vector<256x128xf32>
    %cst_7 = arith.constant 0.000000e+00 : f32
    %11 = vector.broadcast %cst_7 : f32 to vector<256x128xf32>
    %12 = arith.maximumf %10, %11 : vector<256x128xf32>
    %c0_8 = arith.constant 0 : index
    %c0_9 = arith.constant 0 : index
    %13 = vector.load %arg6[%c0_8, %c0_9] : memref<128x256xbf16, #tpu.memory_space<vmem>>, vector<128x256xbf16>
    %14 = arith.truncf %12 : vector<256x128xf32> to vector<256x128xbf16>
    %cst_10 = arith.constant dense<0.000000e+00> : vector<128x128xf32>
    %15 = tpu.matmul %13, %14, %cst_10 {dimension_numbers = #tpu.dot_dimension_numbers<[1], [0], [0], [1], [0, 0, 1, 1], [], []>} : vector<128x256xbf16>, vector<256x128xbf16>, vector<128x128xf32> -> vector<128x128xf32>
    %c0_11 = arith.constant 0 : index
    %c0_12 = arith.constant 0 : index
    %16 = vector.load %arg7[%c0_11, %c0_12] : memref<128x1xf32, #tpu.memory_space<vmem>>, vector<128x1xf32>
    %17 = vector.broadcast %16 : vector<128x1xf32> to vector<128x128xf32>
    %18 = arith.addf %15, %17 : vector<128x128xf32>
    %cst_13 = arith.constant 0.000000e+00 : f32
    %19 = vector.broadcast %cst_13 : f32 to vector<128x128xf32>
    %20 = arith.maximumf %18, %19 : vector<128x128xf32>
    %c0_14 = arith.constant 0 : index
    %c0_15 = arith.constant 0 : index
    %21 = vector.load %arg8[%c0_14, %c0_15] : memref<64x128xbf16, #tpu.memory_space<vmem>>, vector<64x128xbf16>
    %22 = arith.truncf %20 : vector<128x128xf32> to vector<128x128xbf16>
    %cst_16 = arith.constant dense<0.000000e+00> : vector<64x128xf32>
    %23 = tpu.matmul %21, %22, %cst_16 {dimension_numbers = #tpu.dot_dimension_numbers<[1], [0], [0], [1], [0, 0, 1, 1], [], []>} : vector<64x128xbf16>, vector<128x128xbf16>, vector<64x128xf32> -> vector<64x128xf32>
    %c0_17 = arith.constant 0 : index
    %c0_18 = arith.constant 0 : index
    %24 = vector.load %arg9[%c0_17, %c0_18] : memref<64x1xf32, #tpu.memory_space<vmem>>, vector<64x1xf32>
    %25 = vector.broadcast %24 : vector<64x1xf32> to vector<64x128xf32>
    %26 = arith.addf %23, %25 : vector<64x128xf32>
    %cst_19 = arith.constant 0.000000e+00 : f32
    %27 = vector.broadcast %cst_19 : f32 to vector<64x128xf32>
    %28 = arith.maximumf %26, %27 : vector<64x128xf32>
    %c0_20 = arith.constant 0 : index
    %c0_21 = arith.constant 0 : index
    %29 = vector.load %arg10[%c0_20, %c0_21] : memref<4x64xbf16, #tpu.memory_space<vmem>>, vector<4x64xbf16>
    %30 = arith.truncf %28 : vector<64x128xf32> to vector<64x128xbf16>
    %cst_22 = arith.constant dense<0.000000e+00> : vector<4x128xf32>
    %31 = tpu.matmul %29, %30, %cst_22 {dimension_numbers = #tpu.dot_dimension_numbers<[1], [0], [0], [1], [0, 0, 1, 1], [], []>} : vector<4x64xbf16>, vector<64x128xbf16>, vector<4x128xf32> -> vector<4x128xf32>
    %c0_23 = arith.constant 0 : index
    %c0_24 = arith.constant 0 : index
    %32 = vector.load %arg11[%c0_23, %c0_24] : memref<4x1xf32, #tpu.memory_space<vmem>>, vector<4x1xf32>
    %33 = vector.broadcast %32 : vector<4x1xf32> to vector<4x128xf32>
    %34 = arith.addf %31, %33 : vector<4x128xf32>
    %35 = arith.negf %34 : vector<4x128xf32>
    %36 = math.exp %35 : vector<4x128xf32>
    %cst_25 = arith.constant 1.000000e+00 : f32
    %37 = vector.broadcast %cst_25 : f32 to vector<4x128xf32>
    %38 = arith.addf %37, %36 : vector<4x128xf32>
    %39 = arith.divf %37, %38 : vector<4x128xf32>
    %c0_26 = arith.constant 0 : index
    %c0_27 = arith.constant 0 : index
    %40 = vector.load %arg13[%c0_26, %c0_27] : memref<4x32xf32, #tpu.memory_space<vmem>>, vector<4x32xf32>
    %41 = arith.truncf %39 : vector<4x128xf32> to vector<4x128xbf16>
    %cst_28 = arith.constant dense<0.000000e+00> : vector<4x32xf32>
    %42 = tpu.matmul %41, %5, %cst_28 {dimension_numbers = #tpu.dot_dimension_numbers<[1], [1], [0], [0], [0, 0, 1, 0], [], []>} : vector<4x128xbf16>, vector<32x128xbf16>, vector<4x32xf32> -> vector<4x32xf32>
    %43 = arith.addf %40, %42 : vector<4x32xf32>
    %c0_29 = arith.constant 0 : index
    %c0_30 = arith.constant 0 : index
    %44 = vector.load %arg13[%c0_29, %c0_30] : memref<4x32xf32, #tpu.memory_space<vmem>>, vector<4x32xf32>
    tpu.vector_store %arg13[%c0_29, %c0_30], %43 {strides = array<i32>} : memref<4x32xf32, #tpu.memory_space<vmem>>, vector<4x32xf32>,
    %c1_i32 = arith.constant 1 : i32
    %45 = arith.cmpi eq, %arg2, %c1_i32 : i32
    %46 = arith.extui %45 : i1 to i32
    %c0_i32_31 = arith.constant 0 : i32
    %47 = arith.cmpi ne, %46, %c0_i32_31 : i32
    scf.if %47 {
      %c0_32 = arith.constant 0 : index
      %c0_33 = arith.constant 0 : index
      %48 = vector.load %arg13[%c0_32, %c0_33] : memref<4x32xf32, #tpu.memory_space<vmem>>, vector<4x32xf32>
      %49 = vector.shape_cast %48 : vector<4x32xf32> to vector<1x1x4x32xf32>
      %c0_34 = arith.constant 0 : index
      %c0_35 = arith.constant 0 : index
      %c0_36 = arith.constant 0 : index
      %c0_37 = arith.constant 0 : index
      %50 = vector.load %arg12[%c0_34, %c0_35, %c0_36, %c0_37] : memref<1x1x4x32xf32, #tpu.memory_space<vmem>>, vector<1x1x4x32xf32>
      tpu.vector_store %arg12[%c0_34, %c0_35, %c0_36, %c0_37], %49 {strides = array<i32>} : memref<1x1x4x32xf32, #tpu.memory_space<vmem>>, vector<1x1x4x32xf32>,
    } else {
    }
    return
  }
  func.func @transform_0(%arg0: i32, %arg1: i32, %arg2: i32) -> (i32, i32, i32) {
    %c2_i32 = arith.constant 2 : i32
    %0 = arith.muli %arg1, %c2_i32 : i32
    %1 = arith.addi %0, %arg2 : i32
    %c0_i32 = arith.constant 0 : i32
    %c0_i32_0 = arith.constant 0 : i32
    return %arg0, %c0_i32, %1 : i32, i32, i32
  }
  func.func @transform_1(%arg0: i32, %arg1: i32, %arg2: i32) -> (i32, i32) {
    %c0_i32 = arith.constant 0 : i32
    %c0_i32_0 = arith.constant 0 : i32
    %c0_i32_1 = arith.constant 0 : i32
    return %c0_i32, %c0_i32_0 : i32, i32
  }
  func.func @transform_2(%arg0: i32, %arg1: i32, %arg2: i32) -> (i32, i32) {
    %c0_i32 = arith.constant 0 : i32
    %c0_i32_0 = arith.constant 0 : i32
    %c0_i32_1 = arith.constant 0 : i32
    return %c0_i32, %c0_i32_0 : i32, i32
  }
  func.func @transform_3(%arg0: i32, %arg1: i32, %arg2: i32) -> (i32, i32) {
    %c0_i32 = arith.constant 0 : i32
    %c0_i32_0 = arith.constant 0 : i32
    %c0_i32_1 = arith.constant 0 : i32
    return %c0_i32, %c0_i32_0 : i32, i32
  }
  func.func @transform_4(%arg0: i32, %arg1: i32, %arg2: i32) -> (i32, i32) {
    %c0_i32 = arith.constant 0 : i32
    %c0_i32_0 = arith.constant 0 : i32
    %c0_i32_1 = arith.constant 0 : i32
    return %c0_i32, %c0_i32_0 : i32, i32
  }
  func.func @transform_5(%arg0: i32, %arg1: i32, %arg2: i32) -> (i32, i32) {
    %c0_i32 = arith.constant 0 : i32
    %c0_i32_0 = arith.constant 0 : i32
    %c0_i32_1 = arith.constant 0 : i32
    return %c0_i32, %c0_i32_0 : i32, i32
  }
  func.func @transform_6(%arg0: i32, %arg1: i32, %arg2: i32) -> (i32, i32) {
    %c0_i32 = arith.constant 0 : i32
    %c0_i32_0 = arith.constant 0 : i32
    %c0_i32_1 = arith.constant 0 : i32
    return %c0_i32, %c0_i32_0 : i32, i32
  }
  func.func @transform_7(%arg0: i32, %arg1: i32, %arg2: i32) -> (i32, i32) {
    %c0_i32 = arith.constant 0 : i32
    %c0_i32_0 = arith.constant 0 : i32
    %c0_i32_1 = arith.constant 0 : i32
    return %c0_i32, %c0_i32_0 : i32, i32
  }
  func.func @transform_8(%arg0: i32, %arg1: i32, %arg2: i32) -> (i32, i32) {
    %c0_i32 = arith.constant 0 : i32
    %c0_i32_0 = arith.constant 0 : i32
    %c0_i32_1 = arith.constant 0 : i32
    return %c0_i32, %c0_i32_0 : i32, i32
  }
  func.func @transform_9(%arg0: i32, %arg1: i32, %arg2: i32) -> (i32, i32, i32, i32) {
    %c0_i32 = arith.constant 0 : i32
    %c0_i32_0 = arith.constant 0 : i32
    %c0_i32_1 = arith.constant 0 : i32
    return %arg0, %arg1, %c0_i32, %c0_i32_0 : i32, i32, i32, i32
  }
}

module attributes {stable_mosaic.version = 11 : i64} {
  func.func @fc_heads_kernel(%arg0: i32, %arg1: memref<4x2x32xf32, #tpu.memory_space<vmem>>, %arg2: memref<4x32x32xbf16, #tpu.memory_space<vmem>>, %arg3: memref<4x1x32xf32, #tpu.memory_space<vmem>>, %arg4: memref<4x11x32xbf16, #tpu.memory_space<vmem>>, %arg5: memref<1x11xf32, #tpu.memory_space<vmem>>, %arg6: memref<2x11xf32, #tpu.memory_space<vmem>>, %arg7: memref<4x2x32xf32, #tpu.memory_space<vmem>>) attributes {dimension_semantics = [#tpu.dimension_semantics<arbitrary>], iteration_bounds = array<i64: 1>, scalar_prefetch = 0 : i64, scratch_operands = 1 : i64, tpu.core_type = #tpu.core_type<tc>, window_params = [{transform_indices = @transform_0, window_bounds = array<i64: 4, 2, 32>}, {transform_indices = @transform_1, window_bounds = array<i64: 4, 32, 32>}, {pipeline_mode = #tpu.pipeline_mode<synchronous>, transform_indices = @transform_2, window_bounds = array<i64: 4, 1, 32>}, {pipeline_mode = #tpu.pipeline_mode<synchronous>, transform_indices = @transform_3, window_bounds = array<i64: 4, 11, 32>}, {pipeline_mode = #tpu.pipeline_mode<synchronous>, transform_indices = @transform_4, window_bounds = array<i64: 1, 11>}, {pipeline_mode = #tpu.pipeline_mode<synchronous>, transform_indices = @transform_5, window_bounds = array<i64: 2, 11>}]} {
    %c0_i32 = arith.constant 0 : i32
    %0 = arith.cmpi eq, %arg0, %c0_i32 : i32
    %1 = arith.extui %0 : i1 to i32
    %c0_i32_0 = arith.constant 0 : i32
    %2 = arith.cmpi ne, %1, %c0_i32_0 : i32
    scf.if %2 {
      %cst_14 = arith.constant 0.000000e+00 : f32
      %13 = vector.broadcast %cst_14 : f32 to vector<4x2x32xf32>
      %c0_15 = arith.constant 0 : index
      %c0_16 = arith.constant 0 : index
      %c0_17 = arith.constant 0 : index
      %14 = vector.load %arg7[%c0_15, %c0_16, %c0_17] : memref<4x2x32xf32, #tpu.memory_space<vmem>>, vector<4x2x32xf32>
      tpu.vector_store %arg7[%c0_15, %c0_16, %c0_17], %13 {strides = array<i32>} : memref<4x2x32xf32, #tpu.memory_space<vmem>>, vector<4x2x32xf32>,
    } else {
    }
    %c0 = arith.constant 0 : index
    %c0_1 = arith.constant 0 : index
    %c0_2 = arith.constant 0 : index
    %3 = vector.load %arg1[%c0, %c0_1, %c0_2] : memref<4x2x32xf32, #tpu.memory_space<vmem>>, vector<4x2x32xf32>
    %4 = arith.truncf %3 : vector<4x2x32xf32> to vector<4x2x32xbf16>
    %c0_3 = arith.constant 0 : index
    %c0_4 = arith.constant 0 : index
    %c0_5 = arith.constant 0 : index
    %5 = vector.load %arg7[%c0_3, %c0_4, %c0_5] : memref<4x2x32xf32, #tpu.memory_space<vmem>>, vector<4x2x32xf32>
    %c0_6 = arith.constant 0 : index
    %c0_7 = arith.constant 0 : index
    %c0_8 = arith.constant 0 : index
    %6 = vector.load %arg2[%c0_6, %c0_7, %c0_8] : memref<4x32x32xbf16, #tpu.memory_space<vmem>>, vector<4x32x32xbf16>
    %cst = arith.constant dense<0.000000e+00> : vector<4x2x32xf32>
    %7 = tpu.matmul %4, %6, %cst {dimension_numbers = #tpu.dot_dimension_numbers<[2], [2], [1], [1], [0, 0, 0, 1, 1, 1], [0], [0]>} : vector<4x2x32xbf16>, vector<4x32x32xbf16>, vector<4x2x32xf32> -> vector<4x2x32xf32>
    %8 = arith.addf %5, %7 : vector<4x2x32xf32>
    %c0_9 = arith.constant 0 : index
    %c0_10 = arith.constant 0 : index
    %c0_11 = arith.constant 0 : index
    %9 = vector.load %arg7[%c0_9, %c0_10, %c0_11] : memref<4x2x32xf32, #tpu.memory_space<vmem>>, vector<4x2x32xf32>
    tpu.vector_store %arg7[%c0_9, %c0_10, %c0_11], %8 {strides = array<i32>} : memref<4x2x32xf32, #tpu.memory_space<vmem>>, vector<4x2x32xf32>,
    %c0_i32_12 = arith.constant 0 : i32
    %10 = arith.cmpi eq, %arg0, %c0_i32_12 : i32
    %11 = arith.extui %10 : i1 to i32
    %c0_i32_13 = arith.constant 0 : i32
    %12 = arith.cmpi ne, %11, %c0_i32_13 : i32
    scf.if %12 {
      %c0_14 = arith.constant 0 : index
      %c0_15 = arith.constant 0 : index
      %c0_16 = arith.constant 0 : index
      %13 = vector.load %arg7[%c0_14, %c0_15, %c0_16] : memref<4x2x32xf32, #tpu.memory_space<vmem>>, vector<4x2x32xf32>
      %c0_17 = arith.constant 0 : index
      %c0_18 = arith.constant 0 : index
      %c0_19 = arith.constant 0 : index
      %14 = vector.load %arg3[%c0_17, %c0_18, %c0_19] : memref<4x1x32xf32, #tpu.memory_space<vmem>>, vector<4x1x32xf32>
      %15 = vector.broadcast %14 : vector<4x1x32xf32> to vector<4x2x32xf32>
      %16 = arith.addf %13, %15 : vector<4x2x32xf32>
      %17 = arith.negf %16 : vector<4x2x32xf32>
      %18 = math.exp %17 : vector<4x2x32xf32>
      %cst_20 = arith.constant 1.000000e+00 : f32
      %19 = vector.broadcast %cst_20 : f32 to vector<4x2x32xf32>
      %20 = arith.addf %19, %18 : vector<4x2x32xf32>
      %21 = arith.divf %19, %20 : vector<4x2x32xf32>
      %22 = arith.mulf %16, %21 : vector<4x2x32xf32>
      %23 = arith.truncf %22 : vector<4x2x32xf32> to vector<4x2x32xbf16>
      %c0_21 = arith.constant 0 : index
      %c0_22 = arith.constant 0 : index
      %c0_23 = arith.constant 0 : index
      %24 = vector.load %arg4[%c0_21, %c0_22, %c0_23] : memref<4x11x32xbf16, #tpu.memory_space<vmem>>, vector<4x11x32xbf16>
      %cst_24 = arith.constant dense<0.000000e+00> : vector<4x2x11xf32>
      %25 = tpu.matmul %23, %24, %cst_24 {dimension_numbers = #tpu.dot_dimension_numbers<[2], [2], [1], [1], [0, 0, 0, 1, 1, 1], [0], [0]>} : vector<4x2x32xbf16>, vector<4x11x32xbf16>, vector<4x2x11xf32> -> vector<4x2x11xf32>
      %cst_25 = arith.constant dense<0.000000e+00> : vector<2x11xf32>
      %26 = vector.multi_reduction <add>, %25, %cst_25 [0] : vector<4x2x11xf32> to vector<2x11xf32>
      %c0_26 = arith.constant 0 : index
      %c0_27 = arith.constant 0 : index
      %27 = vector.load %arg5[%c0_26, %c0_27] : memref<1x11xf32, #tpu.memory_space<vmem>>, vector<1x11xf32>
      %28 = vector.broadcast %27 : vector<1x11xf32> to vector<2x11xf32>
      %29 = arith.addf %26, %28 : vector<2x11xf32>
      %c0_28 = arith.constant 0 : index
      %c0_29 = arith.constant 0 : index
      %30 = vector.load %arg6[%c0_28, %c0_29] : memref<2x11xf32, #tpu.memory_space<vmem>>, vector<2x11xf32>
      tpu.vector_store %arg6[%c0_28, %c0_29], %29 {strides = array<i32>} : memref<2x11xf32, #tpu.memory_space<vmem>>, vector<2x11xf32>,
    } else {
    }
    return
  }
  func.func @transform_0(%arg0: i32) -> (i32, i32, i32) {
    %c0_i32 = arith.constant 0 : i32
    %c0_i32_0 = arith.constant 0 : i32
    %c0_i32_1 = arith.constant 0 : i32
    return %c0_i32, %c0_i32_0, %arg0 : i32, i32, i32
  }
  func.func @transform_1(%arg0: i32) -> (i32, i32, i32) {
    %c0_i32 = arith.constant 0 : i32
    %c0_i32_0 = arith.constant 0 : i32
    %c0_i32_1 = arith.constant 0 : i32
    return %c0_i32, %c0_i32_0, %arg0 : i32, i32, i32
  }
  func.func @transform_2(%arg0: i32) -> (i32, i32, i32) {
    %c0_i32 = arith.constant 0 : i32
    %c0_i32_0 = arith.constant 0 : i32
    %c0_i32_1 = arith.constant 0 : i32
    %c0_i32_2 = arith.constant 0 : i32
    return %c0_i32, %c0_i32_0, %c0_i32_1 : i32, i32, i32
  }
  func.func @transform_3(%arg0: i32) -> (i32, i32, i32) {
    %c0_i32 = arith.constant 0 : i32
    %c0_i32_0 = arith.constant 0 : i32
    %c0_i32_1 = arith.constant 0 : i32
    %c0_i32_2 = arith.constant 0 : i32
    return %c0_i32, %c0_i32_0, %c0_i32_1 : i32, i32, i32
  }
  func.func @transform_4(%arg0: i32) -> (i32, i32) {
    %c0_i32 = arith.constant 0 : i32
    %c0_i32_0 = arith.constant 0 : i32
    %c0_i32_1 = arith.constant 0 : i32
    return %c0_i32, %c0_i32_0 : i32, i32
  }
  func.func @transform_5(%arg0: i32) -> (i32, i32) {
    %c0_i32 = arith.constant 0 : i32
    %c0_i32_0 = arith.constant 0 : i32
    %c0_i32_1 = arith.constant 0 : i32
    return %c0_i32, %c0_i32_0 : i32, i32
  }
}

</mosaic_0001>

<bundles_post_ra>
// kernel: custom_model_forward.3
= control target key start
LH: loop header
LB: loop body
LE: loop exit
PB: predicated region body
PF: predicated region fallthrough
CT: control target
= control target key end

     0   :  { %v779_v1 = vmov 0.0   ;;  %vm69_vm0 = vcmask 261120   ;;  %vm780_vm1 = vmmov 0   ;;  %vm26_vm2 = vcmask 254976   ;;  %s952_s0 = inlined_call_operand.vmem [shape: f32[4,2,32], index: 0, kind: input, shape index: {}]   ;;  %s953_s1 = inlined_call_operand.vmem [shape: bf16[4,32,32], index: 1, kind: input, shape index: {}]   ;;  %s954_s2 = inlined_call_operand.vmem [shape: f32[4,1,32], index: 2, kind: input, shape index: {}]   ;;  %s955_s3 = inlined_call_operand.vmem [shape: bf16[4,11,32], index: 3, kind: input, shape index: {}]   ;;  %s956_s4 = inlined_call_operand.vmem [shape: f32[1,11], index: 4, kind: input, shape index: {}]   ;;  %s957_s5 = inlined_call_operand.hbm [shape: f32[2,11], index: 5, kind: output, shape index: {}]  }
   0x1   :  { %v727_v0 = vld [vmem:[%s953_s1] sm:$0xff]   ;;  %668 = vmatprep.subr.bf16.mxu0 %v779_v1  ;;  %676 = vmatprep.subr.bf16.mxu1 %v779_v1  ;;  %v728_v2 = vld [vmem:[%s953_s1 + $0x10] sm:$0xff]   ;;  %v729_v5 = vld [vmem:[%s953_s1 + $0x8] sm:$0xff]   ;;  %27 = vst.msk [vmem:[#allocation2] sm:$0x3] %vm26_vm2, %v779_v1 }
   0x2   :  { %v74_v3 = vsel %vm69_vm0, %v727_v0, 0  ;;  %v133_v4 = vsel %vm69_vm0, %v728_v2, 0  ;;  %v730_v6 = vld [vmem:[%s953_s1 + $0x18] sm:$0xff]   ;;  %672 = vmatprep.mubr.msk.bf16.mxu0 %vm780_vm1, %v779_v1  ;;  %680 = vmatprep.mubr.msk.bf16.mxu1 %vm780_vm1, %v779_v1  ;;  %28 = vst.msk [vmem:[#allocation2 + $0x2] sm:$0x3] %vm26_vm2, %v779_v1  ;;  %v77_v7 = vsel %vm69_vm0, %v729_v5, 0 }
   0x3   :  { %669 = vmatpush3.bf16.xpose.msra.mxu0 %v74_v3  ;;  %677 = vmatpush3.bf16.xpose.msra.mxu1 %v133_v4  ;;  %29 = vst.msk [vmem:[#allocation2 + $0x4] sm:$0x3] %vm26_vm2, %v779_v1  ;;  %30 = vst.msk [vmem:[#allocation2 + $0x6] sm:$0x3] %vm26_vm2, %v779_v1  ;;  %v136_v8 = vsel %vm69_vm0, %v730_v6, 0  ;;  %v731_v11 = vld [vmem:[%s953_s1 + $0x20] sm:$0xff]  }
   0x4   :  { %670 = vmatprep.subr.bf16.mxu0 %v779_v1  ;;  %678 = vmatprep.subr.bf16.mxu1 %v779_v1  ;;  %v31_v9 = vld [vmem:[%s952_s0] sm:$0x3]  ;;  %v32_v10 = vld [vmem:[%s952_s0 + $0x2] sm:$0x3]  ;;  %v732_v12 = vld [vmem:[%s953_s1 + $0x30] sm:$0xff]  }
   0xb   :  { %671 = vmatpush3.bf16.xpose.msra.mxu0 %v77_v7  ;;  %679 = vmatpush3.bf16.xpose.msra.mxu1 %v136_v8 }
   0xc   :  { %684 = vmatprep.subr.bf16.mxu0 %v779_v1  ;;  %692 = vmatprep.subr.bf16.mxu1 %v779_v1 }
   0xd   :  { %10 = vsyncpa [#allocation4], 0  ;;  %v35_v13 = vpack.c.bf16 %v31_v9, %v31_v9  ;;  %v36_v14 = vpack.c.bf16 %v32_v10, %v32_v10  ;;  %v192_v15 = vsel %vm69_vm0, %v731_v11, 0  ;;  %v251_v16 = vsel %vm69_vm0, %v732_v12, 0  ;;  %v733_v17 = vld [vmem:[%s953_s1 + $0x28] sm:$0xff]   ;;  %v734_v18 = vld [vmem:[%s953_s1 + $0x38] sm:$0xff]  }
   0xe   :  { %v195_v19 = vsel %vm69_vm0, %v733_v17, 0  ;;  %v254_v20 = vsel %vm69_vm0, %v734_v18, 0  ;;  %v33_v21 = vld [vmem:[%s952_s0 + $0x4] sm:$0x3]  ;;  %v34_v22 = vld [vmem:[%s952_s0 + $0x6] sm:$0x3] }
   0xf   :  { %v37_v23 = vpack.c.bf16 %v33_v21, %v33_v21  ;;  %v38_v24 = vpack.c.bf16 %v34_v22, %v34_v22  ;;  %v735_v25 = vld [vmem:[%s955_s3] sm:$0x3f]   ;;  %v736_v26 = vld [vmem:[%s955_s3 + $0x8] sm:$0x3f]   ;;  %v42_v50 = vld [vmem:[#allocation2 + $0x6] sm:$0x3] }
  0x10   :  { %v393_v27 = vsel %vm69_vm0, %v735_v25, 0  ;;  %v444_v28 = vsel %vm69_vm0, %v736_v26, 0  ;;  %v39_v29 = vld [vmem:[#allocation2] sm:$0x3]  ;;  %v40_v30 = vld [vmem:[#allocation2 + $0x2] sm:$0x3] }
  0x11   :  { %v631_v41 = vld [vmem:[%s954_s2] ss:$0 sm:$0xff]  ;;  %v632_v42 = vld [vmem:[%s954_s2 + $0x1] ss:$0 sm:$0xff]  ;;  %v41_v48 = vld [vmem:[#allocation2 + $0x4] sm:$0x3] }
  0x12   :  { %673 = vmatmul.mubr.msk.bf16.vlgmr.msra.gmra.mrb[0].mxu0 %vm69_vm0, %v35_v13  ;;  %681 = vmatmul.mubr.msk.bf16.vlgmr.msra.gmra.mrb[0].mxu1 %vm69_vm0, %v36_v14  ;;  %v633_v61 = vld [vmem:[%s954_s2 + $0x2] ss:$0 sm:$0xff]  ;;  %v634_v63 = vld [vmem:[%s954_s2 + $0x3] ss:$0 sm:$0xff]  ;;  %v737_v10 = vld [vmem:[%s955_s3 + $0x10] sm:$0x3f]  }
  0x13   :  { %685 = vmatpush3.bf16.xpose.msra.mxu0 %v192_v15  ;;  %693 = vmatpush3.bf16.xpose.msra.mxu1 %v251_v16  ;;  %v738_v12 = vld [vmem:[%s955_s3 + $0x18] sm:$0x3f]   ;;  %v495_v18 = vsel %vm69_vm0, %v737_v10, 0  ;;  %vm588_vm3 = vcmask 82944   ;;  %s781_s6 = smov [#allocation3]  }
  0x14   :  { %686 = vmatprep.subr.bf16.mxu0 %v779_v1  ;;  %694 = vmatprep.subr.bf16.mxu1 %v779_v1  ;;  %v546_v21 = vsel %vm69_vm0, %v738_v12, 0  ;;  %s611_s7 = sshll.u32 %s781_s6, 4  ;;  %s612_s7 = int_to_ptr.vmem [resolvable:$true] %s611_s7 }
  0x15   :  { %688 = vmatprep.mubr.msk.bf16.mxu0 %vm780_vm1, %v779_v1  ;;  %696 = vmatprep.mubr.msk.bf16.mxu1 %vm780_vm1, %v779_v1  ;;  %s755_s8 = scalar_lea.vmem %s612_s7, 32  ;;  %p760_p1 = scmp.lt.s32.totalorder %s612_s7, %s612_s7 }
  0x16   :  { %p756_p0 = scmp.ne.s32.totalorder %s612_s7, %s755_s8  ;;  %p761_p2 = scmp.lt.s32.totalorder %s755_s8, %s755_s8 }
  0x18   :  { %p762_p3 = por %p761_p2, %p760_p1 }
  0x1a   :  { %p763_p4 = pnand %p762_p3, %p756_p0 }
  0x1b   :  { %687 = vmatpush3.bf16.xpose.msra.mxu0 %v195_v19  ;;  %695 = vmatpush3.bf16.xpose.msra.mxu1 %v254_v20 }
  0x1c   :  { %700 = vmatprep.subr.bf16.mxu0 %v779_v1  ;;  %706 = vmatprep.subr.bf16.mxu1 %v779_v1 }
  0x22   :  { %689 = vmatmul.mubr.msk.bf16.vlgmr.msra.gmra.mrb[4].mxu0 %vm69_vm0, %v37_v23  ;;  %697 = vmatmul.mubr.msk.bf16.vlgmr.msra.gmra.mrb[4].mxu1 %vm69_vm0, %v38_v24 }
  0x23   :  { %702 = vmatprep.mubr.msk.bf16.mxu0 %vm780_vm1, %v779_v1  ;;  %708 = vmatprep.mubr.msk.bf16.mxu1 %vm780_vm1, %v779_v1 }
  0x24   :  { %701 = vmatpush3.bf16.xpose.msra.mxu0 %v393_v27  ;;  %707 = vmatpush3.bf16.xpose.msra.mxu1 %v444_v28 }
  0x25   :  { %712 = vmatprep.subr.bf16.mxu0 %v779_v1  ;;  %718 = vmatprep.subr.bf16.mxu1 %v779_v1 }
  0xe5   :  { %v113_v31 = vpop.f32.mrb[0].mxu0  ;;  %v172_v33 = vpop.f32.mrb[0].mxu1 }
  0xe6   :  { %v296_v32 = vadd.f32 %v113_v31, %v39_v29  ;;  %v674_v34 = vpop.f32.mrb[1].mxu0  ;;  %v297_v35 = vadd.f32 %v172_v33, %v40_v30  ;;  %v682_v36 = vpop.f32.mrb[1].mxu1 }
  0xe7   :  { %v116_v37 = vpop.f32.mrb[2].mxu0  ;;  %v175_v38 = vpop.f32.mrb[2].mxu1 }
  0xe8   :  { %301 = vst.msk [vmem:[#allocation2] sm:$0x3] %vm26_vm2, %v296_v32  ;;  %v675_v39 = vpop.f32.mrb[3].mxu0  ;;  %302 = vst.msk [vmem:[#allocation2 + $0x2] sm:$0x3] %vm26_vm2, %v297_v35  ;;  %v683_v40 = vpop.f32.mrb[3].mxu1 }
  0xef   :  { %v308_v43 = vld [vmem:[#allocation2] sm:$0x3]  ;;  %v309_v45 = vld [vmem:[#allocation2 + $0x2] sm:$0x3] }
  0xf0   :  { %v340_v44 = vadd.f32 %v631_v41, %v308_v43  ;;  %v341_v46 = vadd.f32 %v632_v42, %v309_v45 }
  0xf2   :  { %v635_v47 = vmul.f32 -1.442695, %v340_v44  ;;  %v636_v49 = vmul.f32 -1.442695, %v341_v46 }
  0xf4   :  { %739 = vpow2.f32 %v635_v47 }
  0xf5   :  { %v231_v51 = vpop.f32.mrb[4].mxu0  ;;  %741 = vpow2.f32 %v636_v49  ;;  %v290_v53 = vpop.f32.mrb[4].mxu1 }
  0xf6   :  { %v298_v52 = vadd.f32 %v231_v51, %v41_v48  ;;  %v690_v54 = vpop.f32.mrb[5].mxu0  ;;  %v299_v55 = vadd.f32 %v290_v53, %v42_v50  ;;  %v698_v56 = vpop.f32.mrb[5].mxu1  ;;  %v647_v48 = vld [vmem:[%s956_s4] ss:$0 sm:$0xff] }
  0xf7   :  { %v234_v57 = vpop.f32.mrb[6].mxu0  ;;  %v293_v58 = vpop.f32.mrb[6].mxu1 }
  0xf8   :  { %303 = vst.msk [vmem:[#allocation2 + $0x4] sm:$0x3] %vm26_vm2, %v298_v52  ;;  %v691_v59 = vpop.f32.mrb[7].mxu0  ;;  %304 = vst.msk [vmem:[#allocation2 + $0x6] sm:$0x3] %vm26_vm2, %v299_v55  ;;  %v699_v60 = vpop.f32.mrb[7].mxu1 }
  0xfe   :  { %v740_v62 = vpop.eup %739 }
  0xff   :  { %v742_v0 = vpop.eup %741  ;;  %v356_v2 = vadd.f32 1.0, %v740_v62  ;;  %v310_v3 = vld [vmem:[#allocation2 + $0x4] sm:$0x3]  ;;  %v311_v6 = vld [vmem:[#allocation2 + $0x6] sm:$0x3] }
 0x100   :  { %v357_v4 = vadd.f32 1.0, %v742_v0  ;;  %v342_v5 = vadd.f32 %v633_v61, %v310_v3  ;;  %v343_v7 = vadd.f32 %v634_v63, %v311_v6 }
 0x101   :  { %743 = vrcp.f32 %v356_v2 }
 0x102   :  { %745 = vrcp.f32 %v357_v4  ;;  %v637_v8 = vmul.f32 -1.442695, %v342_v5  ;;  %v638_v9 = vmul.f32 -1.442695, %v343_v7 }
 0x104   :  { %747 = vpow2.f32 %v637_v8 }
 0x105   :  { %749 = vpow2.f32 %v638_v9 }
 0x10b   :  { %v744_v11 = vpop.eup %743 }
 0x10c   :  { %v746_v13 = vpop.eup %745  ;;  %v368_v14 = vmul.f32 %v744_v11, %v340_v44 }
 0x10d   :  { %v369_v15 = vmul.f32 %v746_v13, %v341_v46 }
 0x10e   :  { %v748_v16 = vpop.eup %747  ;;  %v372_v17 = vpack.c.bf16 %v368_v14, %v368_v14 }
 0x10f   :  { %v750_v19 = vpop.eup %749  ;;  %v373_v20 = vpack.c.bf16 %v369_v15, %v369_v15  ;;  %v358_v22 = vadd.f32 1.0, %v748_v16 }
 0x110   :  { %703 = vmatmul.mubr.msk.bf16.vlgmr.msra.gmra.mrb[8].mxu0 %vm69_vm0, %v372_v17  ;;  %v359_v23 = vadd.f32 1.0, %v750_v19 }
 0x111   :  { %709 = vmatmul.mubr.msk.bf16.vlgmr.msra.gmra.mrb[8].mxu1 %vm69_vm0, %v373_v20  ;;  %713 = vmatpush3.bf16.xpose.msra.mxu0 %v495_v18  ;;  %751 = vrcp.f32 %v358_v22 }
 0x112   :  { %719 = vmatpush3.bf16.xpose.msra.mxu1 %v546_v21  ;;  %714 = vmatprep.mubr.msk.bf16.mxu0 %vm780_vm1, %v779_v1  ;;  %753 = vrcp.f32 %v359_v23 }
 0x113   :  { %720 = vmatprep.mubr.msk.bf16.mxu1 %vm780_vm1, %v779_v1 }
 0x11b   :  { %v752_v24 = vpop.eup %751 }
 0x11c   :  { %v754_v25 = vpop.eup %753  ;;  %v370_v26 = vmul.f32 %v752_v24, %v342_v5 }
 0x11d   :  { %v371_v27 = vmul.f32 %v754_v25, %v343_v7 }
 0x11e   :  { %v374_v28 = vpack.c.bf16 %v370_v26, %v370_v26 }
 0x11f   :  { %v375_v29 = vpack.c.bf16 %v371_v27, %v371_v27 }
 0x120   :  { %715 = vmatmul.mubr.msk.bf16.vlgmr.msra.gmra.mrb[12].mxu0 %vm69_vm0, %v374_v28 }
 0x121   :  { %721 = vmatmul.mubr.msk.bf16.vlgmr.msra.gmra.mrb[12].mxu1 %vm69_vm0, %v375_v29 }
 0x1e3   :  { %v429_v30 = vpop.f32.mrb[8].mxu0 }
 0x1e4   :  { %v589_v31 = vsel %vm588_vm3, %v429_v30, 0.0  ;;  %v480_v32 = vpop.f32.mrb[8].mxu1  ;;  %v704_v33 = vpop.f32.mrb[9].mxu0 }
 0x1e5   :  { %v590_v34 = vsel %vm588_vm3, %v480_v32, 0.0  ;;  %v710_v35 = vpop.f32.mrb[9].mxu1  ;;  %v432_v1 = vpop.f32.mrb[10].mxu0 }
 0x1e6   :  { %v591_v36 = vadd.f32 %v590_v34, %v589_v31  ;;  %v483_v37 = vpop.f32.mrb[10].mxu1  ;;  %v705_v38 = vpop.f32.mrb[11].mxu0 }
 0x1e7   :  { %v711_v39 = vpop.f32.mrb[11].mxu1 }
 0x1f3   :  { %v531_v40 = vpop.f32.mrb[12].mxu0 }
 0x1f4   :  { %v592_v41 = vsel %vm588_vm3, %v531_v40, 0.0  ;;  %v582_v42 = vpop.f32.mrb[12].mxu1  ;;  %v716_v43 = vpop.f32.mrb[13].mxu0 }
 0x1f5   :  { %v593_v44 = vadd.f32 %v592_v41, %v591_v36  ;;  %v722_v45 = vpop.f32.mrb[13].mxu1  ;;  %v534_v46 = vpop.f32.mrb[14].mxu0  ;;  %v594_v47 = vsel %vm588_vm3, %v582_v42, 0.0 }
 0x1f6   :  { %v585_v49 = vpop.f32.mrb[14].mxu1  ;;  %v717_v50 = vpop.f32.mrb[15].mxu0 }
 0x1f7   :  { %v595_v51 = vadd.f32 %v594_v47, %v593_v44  ;;  %v723_v52 = vpop.f32.mrb[15].mxu1 }
 0x1f9   :  { %v603_v53 = vadd.f32 %v647_v48, %v595_v51 }
 0x1fb   :  { %604 = vst.msk [vmem:[#allocation3] sm:$0x3] %vm588_vm3, %v603_v53 }
 0x1fc   :  { %766 = shalt.err (!%p763_p4)
}
 0x1fd   :  { %s767_s4 = scalar_lea.hbm %s957_s5, 32 }
 0x1fe   :  { %p768_p5 = scmp.ne.s32.totalorder %s957_s5, %s767_s4  ;;  %p771_p6 = scmp.lt.u32.totalorder %s767_s4, %s957_s5 }
 0x200   :  { %p773_p7 = pnand %p771_p6, %p768_p5 }
 0x202   :  { %776 = shalt.err (!%p773_p7)
}
 0x203   :  { %614 = dma.vmem_to_hbm [thread:$0]  %s612_s7, 32, %s957_s5, [#allocation4]  }
 0x204   :  { %777 = dma.done.wait [#allocation4], 32  }
 0x205   :  { %778 = vsyncadd [#allocation4], 4294967264 }
 0x206   :  { %618 = vsyncpa [#allocation4], 1 }

// kernel: custom_model_forward.2
= control target key start
LH: loop header
LB: loop body
LE: loop exit
PB: predicated region body
PF: predicated region fallthrough
CT: control target
= control target key end

     0   :  { %s2126_s30 = smov 0   ;;  %s2128_s10 = smov 0   ;;  %s2600_s0 = inlined_call_operand.vmem [shape: f32[2,32,256], index: 0, kind: input, shape index: {}]   ;;  %s2601_s1 = inlined_call_operand.vmem [shape: bf16[256,32], index: 1, kind: input, shape index: {}]   ;;  %s2602_s2 = inlined_call_operand.vmem [shape: f32[256,1], index: 2, kind: input, shape index: {}]   ;;  %s2603_s3 = inlined_call_operand.vmem [shape: bf16[128,256], index: 3, kind: input, shape index: {}]   ;;  %s2604_s4 = inlined_call_operand.vmem [shape: f32[128,1], index: 4, kind: input, shape index: {}]   ;;  %s2605_s5 = inlined_call_operand.vmem [shape: bf16[64,128], index: 5, kind: input, shape index: {}]   ;;  %s2606_s6 = inlined_call_operand.vmem [shape: f32[64,1], index: 6, kind: input, shape index: {}]   ;;  %s2607_s7 = inlined_call_operand.vmem [shape: bf16[4,64], index: 7, kind: input, shape index: {}]   ;;  %s2608_s8 = inlined_call_operand.vmem [shape: f32[4,1], index: 8, kind: input, shape index: {}]   ;;  %s2609_s9 = inlined_call_operand.vmem [shape: f32[2,1,4,32], index: 9, kind: output, shape index: {}]  }
   0x1   :  { %s2130_s11 = smov 0   ;;  %s2132_s12 = smov 0  }
   0x2   :  { %s2134_s13 = smov 0   ;;  %s2136_s14 = smov 0  }
   0x3   :  { %s2138_s15 = smov 0  }
   0x4 LB: > { %s31_s16 = sadd.s32 1, %s2062_s13  ;;  %s38_s17 = sadd.s32 1, %s2066_s14  ;;  %s2070_s15 = sphi %s2138_s15, %s19_s15   ;;  %s2066_s14 = sphi %s2136_s14, %s2615_s14   ;;  %s2062_s13 = sphi %s2134_s13, %s2614_s13   ;;  %s2058_s12 = sphi %s2132_s12, %s2613_s12   ;;  %s2054_s11 = sphi %s2130_s11, %s2612_s11   ;;  %s2050_s10 = sphi %s2128_s10, %s2611_s10   ;;  %s2046_s30 = sphi %s2126_s30, %s2610_s30  }
   0x5   : > { %p32_p0 = scmp.ge.s32.totalorder %s31_s16, 2  ;;  %p58_p1 = scmp.ne.s32.totalorder %s2050_s10, %s2046_s30 }
   0x6   : > { %p59_p2 = scmp.eq.s32.totalorder %s2070_s15, 0  ;;  %s51_s21 = sadd.s32 1, %s2050_s10 }
   0x7   : > { %s2617_s16 = smov (%p32_p0, %s31_s16), 0  ;;  %s2619_s17 = smov (!%p32_p0, %s38_s17), %s2066_s14 }
   0x8   : > { %p60_p3 = por %p59_p2, %p58_p1  ;;  %p40_p4 = scmp.ge.s32.totalorder %s2619_s17, 2 }
   0x9   : > { %s47_s18 = ssub.s32 %s2062_s13, %s2617_s16  ;;  %p1659_p6 = scmp.ge.s32.totalorder %s2070_s15, 4 }
   0xa   : > { %s2621_s17 = smov (%p40_p4, %s2619_s17), 0 }
   0xb   : > { %s46_s19 = ssub.s32 %s2066_s14, %s2621_s17  ;;  %304 = sbr.rel (%p1659_p6) target bundleno = 26 (0x1a), region = 48 }
   0xc   : > { %s48_s20 = sor.u32 %s47_s18, %s46_s19 }
   0xd   : > { %p49_p5 = scmp.eq.s32.totalorder %s48_s20, 0 }
   0xf   : > { %s2177_s22 = scalar_select %p49_p5, %s2050_s10, %s51_s21  }
  0x12   : > { %307 = sbr.rel (!%p60_p3) target bundleno = 26 (0x1a), region = 52  ;;  %s309_s23 = sand.u32 (%p60_p3), 1, %s2050_s10  }
  0x13   : > { %s1661_s24 = sshll.u32 (%p60_p3), %s2066_s14, 3  ;;  %s1660_s25 = sshll.u32 (%p60_p3), %s309_s23, 5 }
  0x14   : > { %s315_s26 = sadd.s32 (%p60_p3), %s2062_s13, %s1661_s24  ;;  %s311_s19 = scalar_lea.vmem (%p60_p3), [#allocation3], %s1660_s25 }
  0x15   : > { %s1662_s27 = sshll.u32 (%p60_p3), %s315_s26, 3 }
  0x16   : > { %s317_s18 = scalar_lea.vmem (%p60_p3), %s2600_s0, %s1662_s27 }
  0x17   : > { %v351_v0 = vld [vmem:[%s317_s18] sm:$0xff] (%p60_p3)  ;;  %v353_v1 = vld [vmem:[%s317_s18 + $0x10] sm:$0xff] (%p60_p3) }
  0x18   : > { %v355_v2 = vld [vmem:[%s317_s18 + $0x20] sm:$0xff] (%p60_p3)  ;;  %352 = vst [vmem:[%s311_s19] sm:$0xff] (%p60_p3), %v351_v0  ;;  %354 = vst [vmem:[%s311_s19 + $0x8] sm:$0xff] (%p60_p3), %v353_v1  ;;  %v357_v3 = vld [vmem:[%s317_s18 + $0x30] sm:$0xff] (%p60_p3) }
  0x19   : > { %356 = vst [vmem:[%s311_s19 + $0x10] sm:$0xff] %v355_v2  ;;  %358 = vst [vmem:[%s311_s19 + $0x18] sm:$0xff] %v357_v3 }
  0x1a PF: > { %p1663_p7 = scmp.ge.s32.totalorder %s2070_s15, 1  ;;  %p363_p8 = scmp.lt.s32.totalorder %s2070_s15, 5 }
  0x1c   : > { %p364_p9 = pnand %p1663_p7, %p363_p8 }
  0x1d   : > { %s370_s20 = sand.u32 (!%p364_p9), 1, %s2046_s30   ;;  %p409_p10 = scmp.lt.s32.totalorder (!%p364_p9), %s2058_s12, 1 }
  0x1e   : > { %367 = sbr.rel (%p364_p9) target bundleno = 1326 (0x52e), region = 90  ;;  %s1664_s21 = sshll.u32 (!%p364_p9), %s370_s20, 5 }
  0x1f   : > { %s372_s27 = scalar_lea.vmem (!%p364_p9), [#allocation3], %s1664_s21  ;;  %p1666_p11 = scmp.ne.s32.totalorder (!%p364_p9), %s2054_s11, 0 }
  0x25   : > { %s2623_s12 = smov (!%p409_p10, %s2058_s12), 1  ;;  %420 = sbr.rel (%p1666_p11) target bundleno = 44 (0x2c), region = 98 }
  0x26   : > { %s1665_s23 = sshll.u32 %s2623_s12, 2  ;;  %vm421_vm0 = vcmask (!%p1666_p11), 257024   ;;  %v2072_v4 = vmov (!%p1666_p11), 0.0  }
  0x27   : > { %s2194_s26 = scalar_lea.vmem %s2609_s9, %s1665_s23  ;;  %422 = vst.msk [vmem:[#allocation2] sm:$0xf] (!%p1666_p11), %vm421_vm0, %v2072_v4 }
  0x2c PF: > { %v477_v5 = vld [vmem:[%s2602_s2 + $0x80] sm:$0xff]  ;;  %v2073_v8 = vmov 0   ;;  %v424_v9 = vld [vmem:[%s372_s27 + $0x8] sm:$0xff]  ;;  %v425_v12 = vld [vmem:[%s372_s27 + $0x10] sm:$0xff]  ;;  %vm733_vm1 = vcmask 261120   ;;  %vm2075_vm2 = vmmov 0  }
  0x2d   : > { %v461_v6 = vld [vmem:[%s2602_s2] sm:$0xff]  ;;  %1967 = vset.pattern.permute.xlu1 %v2073_v8  ;;  %1966 = vset.pattern.permute.xlu0 %v2073_v8  ;;  %v478_v11 = vld [vmem:[%s2602_s2 + $0x88] sm:$0xff]  ;;  %v479_v17 = vld [vmem:[%s2602_s2 + $0x90] sm:$0xff]  ;;  %vm1468_vm3 = vcmask 523264   ;;  %vm1561_vm4 = vcmask 257024   ;;  %p1721_p12 = scmp.ne.s32.totalorder %s2054_s11, 1 }
  0x2e   : > { %v423_v7 = vld [vmem:[%s372_s27] sm:$0xff]  ;;  %575 = vperm.xlu0 %1966, %v477_v5   ;;  %495 = vperm.xlu1 %1967, %v461_v6   ;;  %v426_v13 = vld [vmem:[%s372_s27 + $0x18] sm:$0xff]  ;;  %v1970_v20 = vld [vmem:[%s2601_s1 + $0x10] sm:$0xff]  }
  0x2f   : > { %v2203_v10 = vpack.c.bf16 %v424_v9, %v423_v7  ;;  %v462_v14 = vld [vmem:[%s2602_s2 + $0x8] sm:$0xff]  ;;  %v2211_v15 = vpack.c.bf16 %v426_v13, %v425_v12  ;;  %v1968_v16 = vld [vmem:[%s2601_s1] sm:$0xff]   ;;  %v480_v18 = vld [vmem:[%s2602_s2 + $0x98] sm:$0xff] }
  0x30   : > { %1830 = vmatprep.mubr.msk.bf16.mxu0 %vm733_vm1, %v1968_v16  ;;  %v1969_v19 = vld [vmem:[%s2601_s1 + $0x8] sm:$0xff]   ;;  %v463_v21 = vld [vmem:[%s2602_s2 + $0x10] sm:$0xff]  ;;  %v464_v22 = vld [vmem:[%s2602_s2 + $0x18] sm:$0xff] }
  0x31   : > { %1826 = vmatprep.subr.bf16.mxu0 %v2203_v10  ;;  %v481_v23 = vld [vmem:[%s2602_s2 + $0xa0] sm:$0xff]  ;;  %v482_v24 = vld [vmem:[%s2602_s2 + $0xa8] sm:$0xff]  ;;  %v1971_v25 = vld [vmem:[%s2601_s1 + $0x18] sm:$0xff]  }
  0x32   : > { %1827 = vmatpush3.bf16.msra.mxu0 %v2203_v10  ;;  %580 = vperm.xlu0 %1966, %v478_v11   ;;  %v1972_v26 = vld [vmem:[%s2601_s1 + $0x20] sm:$0xff]   ;;  %v466_v28 = vld [vmem:[%s2602_s2 + $0x28] sm:$0xff]  ;;  %v483_v29 = vld [vmem:[%s2602_s2 + $0xb0] sm:$0xff] }
  0x33   : > { %500 = vperm.xlu1 %1967, %v462_v14   ;;  %1828 = vmatprep.subr.bf16.mxu0 %v2211_v15  ;;  %v465_v27 = vld [vmem:[%s2602_s2 + $0x20] sm:$0xff]  ;;  %v484_v30 = vld [vmem:[%s2602_s2 + $0xb8] sm:$0xff]  ;;  %v1973_v31 = vld [vmem:[%s2601_s1 + $0x28] sm:$0xff]  }
  0x34   : > { %v1974_v32 = vld [vmem:[%s2601_s1 + $0x30] sm:$0xff]   ;;  %v468_v34 = vld [vmem:[%s2602_s2 + $0x38] sm:$0xff]  ;;  %v485_v35 = vld [vmem:[%s2602_s2 + $0xc0] sm:$0xff] }
  0x35   : > { %v467_v33 = vld [vmem:[%s2602_s2 + $0x30] sm:$0xff]  ;;  %v486_v36 = vld [vmem:[%s2602_s2 + $0xc8] sm:$0xff]  ;;  %v1975_v37 = vld [vmem:[%s2601_s1 + $0x38] sm:$0xff]  }
  0x36   : > { %1829 = vmatpush3.bf16.msra.mxu0 %v2211_v15  ;;  %585 = vperm.xlu0 %1966, %v479_v17   ;;  %v1976_v38 = vld [vmem:[%s2601_s1 + $0x40] sm:$0xff]   ;;  %v470_v40 = vld [vmem:[%s2602_s2 + $0x48] sm:$0xff]  ;;  %v487_v41 = vld [vmem:[%s2602_s2 + $0xd0] sm:$0xff] }
  0x37   : > { %590 = vperm.xlu1 %1967, %v480_v18   ;;  %v469_v39 = vld [vmem:[%s2602_s2 + $0x40] sm:$0xff]  ;;  %v488_v42 = vld [vmem:[%s2602_s2 + $0xd8] sm:$0xff]  ;;  %v1977_v43 = vld [vmem:[%s2601_s1 + $0x48] sm:$0xff]  }
  0x38   : > { %v1978_v44 = vld [vmem:[%s2601_s1 + $0x50] sm:$0xff]   ;;  %v472_v46 = vld [vmem:[%s2602_s2 + $0x58] sm:$0xff]  ;;  %v489_v47 = vld [vmem:[%s2602_s2 + $0xe0] sm:$0xff] }
  0x39   : > { %1831 = vmatmul.mubr.msk.bf16.vlgmr.msra.gmra.mrb[0].mxu0 %vm733_vm1, %v1969_v19  ;;  %v471_v45 = vld [vmem:[%s2602_s2 + $0x50] sm:$0xff]  ;;  %v490_v48 = vld [vmem:[%s2602_s2 + $0xe8] sm:$0xff]  ;;  %v1979_v49 = vld [vmem:[%s2601_s1 + $0x58] sm:$0xff]  }
  0x3a   : > { %1834 = vmatprep.mubr.msk.bf16.mxu0 %vm733_vm1, %v1970_v20  ;;  %505 = vperm.xlu0 %1966, %v463_v21   ;;  %v1980_v50 = vld [vmem:[%s2601_s1 + $0x60] sm:$0xff]   ;;  %v474_v52 = vld [vmem:[%s2602_s2 + $0x68] sm:$0xff]  ;;  %v491_v53 = vld [vmem:[%s2602_s2 + $0xf0] sm:$0xff] }
  0x3b   : > { %510 = vperm.xlu1 %1967, %v464_v22   ;;  %v473_v51 = vld [vmem:[%s2602_s2 + $0x60] sm:$0xff]  ;;  %v492_v54 = vld [vmem:[%s2602_s2 + $0xf8] sm:$0xff]  ;;  %v1981_v55 = vld [vmem:[%s2601_s1 + $0x68] sm:$0xff]  }
  0x3c   : > { %v1982_v56 = vld [vmem:[%s2601_s1 + $0x70] sm:$0xff]   ;;  %v476_v58 = vld [vmem:[%s2602_s2 + $0x78] sm:$0xff]  ;;  %v1007_v59 = vld [vmem:[%s2604_s4] sm:$0xff] }
  0x3d   : > { %v475_v57 = vld [vmem:[%s2602_s2 + $0x70] sm:$0xff]  ;;  %v1008_v60 = vld [vmem:[%s2604_s4 + $0x8] sm:$0xff]  ;;  %v1983_v61 = vld [vmem:[%s2601_s1 + $0x78] sm:$0xff]  }
  0x3e   : > { %595 = vperm.xlu0 %1966, %v481_v23   ;;  %v1009_v62 = vld [vmem:[%s2604_s4 + $0x10] sm:$0xff]  ;;  %v1010_v63 = vld [vmem:[%s2604_s4 + $0x18] sm:$0xff]  ;;  %v1011_v0 = vld [vmem:[%s2604_s4 + $0x20] sm:$0xff] }
  0x3f   : > { %600 = vperm.xlu1 %1967, %v482_v24   ;;  %v1012_v1 = vld [vmem:[%s2604_s4 + $0x28] sm:$0xff]  ;;  %v1013_v2 = vld [vmem:[%s2604_s4 + $0x30] sm:$0xff]  ;;  %v1014_v3 = vld [vmem:[%s2604_s4 + $0x38] sm:$0xff] }
  0x40   : > { %v1015_v4 = vld [vmem:[%s2604_s4 + $0x40] sm:$0xff]  ;;  %v1016_v5 = vld [vmem:[%s2604_s4 + $0x48] sm:$0xff]  ;;  %v1017_v6 = vld [vmem:[%s2604_s4 + $0x50] sm:$0xff] }
  0x41   : > { %1835 = vmatmul.mubr.msk.bf16.gmra.mrb[4].mxu0 %vm733_vm1, %v1971_v25  ;;  %v1018_v7 = vld [vmem:[%s2604_s4 + $0x58] sm:$0xff]  ;;  %v1019_v8 = vld [vmem:[%s2604_s4 + $0x60] sm:$0xff]  ;;  %v1020_v9 = vld [vmem:[%s2604_s4 + $0x68] sm:$0xff] }
  0x42   : > { %1838 = vmatprep.mubr.msk.bf16.mxu0 %vm733_vm1, %v1972_v26  ;;  %515 = vperm.xlu0 %1966, %v465_v27   ;;  %v1021_v11 = vld [vmem:[%s2604_s4 + $0x70] sm:$0xff]  ;;  %v1022_v12 = vld [vmem:[%s2604_s4 + $0x78] sm:$0xff]  ;;  %v1312_v13 = vld [vmem:[%s2606_s6] sm:$0xff] }
  0x43   : > { %520 = vperm.xlu1 %1967, %v466_v28   ;;  %v1313_v14 = vld [vmem:[%s2606_s6 + $0x8] sm:$0xff]  ;;  %v1314_v16 = vld [vmem:[%s2606_s6 + $0x10] sm:$0xff]  ;;  %v1315_v17 = vld [vmem:[%s2606_s6 + $0x18] sm:$0xff] }
  0x44   : > { %v1316_v18 = vld [vmem:[%s2606_s6 + $0x20] sm:$0xff]  ;;  %v1317_v19 = vld [vmem:[%s2606_s6 + $0x28] sm:$0xff]  ;;  %v1318_v20 = vld [vmem:[%s2606_s6 + $0x30] sm:$0xff] }
  0x45   : > { %v1319_v21 = vld [vmem:[%s2606_s6 + $0x38] sm:$0xff]  ;;  %v1462_v22 = vld [vmem:[%s2608_s8] sm:$0xf]  ;;  %v1986_v27 = vld [vmem:[%s2603_s3 + $0x4] ss:$8 sps:$4 sm:$0xff]  }
  0x46   : > { %605 = vperm.xlu0 %1966, %v483_v29   ;;  %1215 = vmatprep.mubr.bf16.mxu1 %v1986_v27 }
  0x47   : > { %610 = vperm.xlu1 %1967, %v484_v30  }
  0x49   : > { %1839 = vmatmul.mubr.msk.bf16.gmra.mrb[8].mxu0 %vm733_vm1, %v1973_v31 }
  0x4a   : > { %1842 = vmatprep.mubr.msk.bf16.mxu0 %vm733_vm1, %v1974_v32  ;;  %525 = vperm.xlu0 %1966, %v467_v33  }
  0x4b   : > { %530 = vperm.xlu1 %1967, %v468_v34  }
  0x4e   : > { %615 = vperm.xlu0 %1966, %v485_v35  }
  0x4f   : > { %620 = vperm.xlu1 %1967, %v486_v36  }
  0x51   : > { %1843 = vmatmul.mubr.msk.bf16.gmra.mrb[12].mxu0 %vm733_vm1, %v1975_v37 }
  0x52   : > { %1846 = vmatprep.mubr.msk.bf16.mxu0 %vm733_vm1, %v1976_v38  ;;  %535 = vperm.xlu0 %1966, %v469_v39  }
  0x53   : > { %540 = vperm.xlu1 %1967, %v470_v40  }
  0x56   : > { %625 = vperm.xlu0 %1966, %v487_v41  }
  0x57   : > { %630 = vperm.xlu1 %1967, %v488_v42  }
  0x59   : > { %1847 = vmatmul.mubr.msk.bf16.gmra.mrb[16].mxu0 %vm733_vm1, %v1977_v43 }
  0x5a   : > { %1850 = vmatprep.mubr.msk.bf16.mxu0 %vm733_vm1, %v1978_v44  ;;  %545 = vperm.xlu0 %1966, %v471_v45  }
  0x5b   : > { %550 = vperm.xlu1 %1967, %v472_v46  }
  0x5e   : > { %635 = vperm.xlu0 %1966, %v489_v47  }
  0x5f   : > { %640 = vperm.xlu1 %1967, %v490_v48  }
  0x61   : > { %1851 = vmatmul.mubr.msk.bf16.gmra.mrb[20].mxu0 %vm733_vm1, %v1979_v49 }
  0x62   : > { %1854 = vmatprep.mubr.msk.bf16.mxu0 %vm733_vm1, %v1980_v50  ;;  %555 = vperm.xlu0 %1966, %v473_v51  }
  0x63   : > { %560 = vperm.xlu1 %1967, %v474_v52  }
  0x66   : > { %645 = vperm.xlu0 %1966, %v491_v53  }
  0x67   : > { %650 = vperm.xlu1 %1967, %v492_v54  }
  0x69   : > { %1855 = vmatmul.mubr.msk.bf16.gmra.mrb[24].mxu0 %vm733_vm1, %v1981_v55 }
  0x6a   : > { %1858 = vmatprep.mubr.msk.bf16.mxu0 %vm733_vm1, %v1982_v56  ;;  %565 = vperm.xlu0 %1966, %v475_v57  }
  0x6b   : > { %570 = vperm.xlu1 %1967, %v476_v58  }
  0x6e   : > { %1025 = vperm.xlu0 %1966, %v1007_v59  }
  0x6f   : > { %1030 = vperm.xlu1 %1967, %v1008_v60  }
  0x71   : > { %1859 = vmatmul.mubr.msk.bf16.gmra.mrb[28].mxu0 %vm733_vm1, %v1983_v61 }
  0x72   : > { %1035 = vperm.xlu0 %1966, %v1009_v62  }
  0x73   : > { %1040 = vperm.xlu1 %1967, %v1010_v63  }
  0x76   : > { %1045 = vperm.xlu0 %1966, %v1011_v0  }
  0x77   : > { %1050 = vperm.xlu1 %1967, %v1012_v1  }
  0x7a   : > { %1055 = vperm.xlu0 %1966, %v1013_v2  }
  0x7b   : > { %1060 = vperm.xlu1 %1967, %v1014_v3  }
  0x7e   : > { %1065 = vperm.xlu0 %1966, %v1015_v4  }
  0x7f   : > { %1070 = vperm.xlu1 %1967, %v1016_v5  }
  0x82   : > { %1075 = vperm.xlu0 %1966, %v1017_v6  }
  0x83   : > { %1080 = vperm.xlu1 %1967, %v1018_v7  }
  0x86   : > { %1085 = vperm.xlu0 %1966, %v1019_v8  }
  0x87   : > { %1090 = vperm.xlu1 %1967, %v1020_v9  }
  0x8a   : > { %1095 = vperm.xlu0 %1966, %v1021_v11  }
  0x8b   : > { %1100 = vperm.xlu1 %1967, %v1022_v12  }
  0x8e   : > { %1322 = vperm.xlu0 %1966, %v1312_v13  }
  0x8f   : > { %1327 = vperm.xlu1 %1967, %v1313_v14  }
  0x92   : > { %1332 = vperm.xlu0 %1966, %v1314_v16  }
  0x93   : > { %1337 = vperm.xlu1 %1967, %v1315_v17  }
  0x96   : > { %1342 = vperm.xlu0 %1966, %v1316_v18  }
  0x97   : > { %1347 = vperm.xlu1 %1967, %v1317_v19  }
  0x9a   : > { %1352 = vperm.xlu0 %1966, %v1318_v20  }
  0x9b   : > { %1357 = vperm.xlu1 %1967, %v1319_v21  }
  0x9e   : > { %1465 = vperm.xlu0 %1966, %v1462_v22  }
  0xad   : > { %v2440_v23 = vpop.permute.xlu0 %575  ;;  %v496_v24 = vpop.permute.xlu1 %495 }
  0xb1   : > { %v2442_v25 = vpop.permute.xlu0 %580 }
  0xb2   : > { %v501_v26 = vpop.permute.xlu1 %500 }
  0xb5   : > { %v2447_v28 = vpop.permute.xlu0 %585 }
  0xb6   : > { %v2449_v29 = vpop.permute.xlu1 %590 }
  0xb9   : > { %v506_v30 = vpop.permute.xlu0 %505 }
  0xba   : > { %v511_v31 = vpop.permute.xlu1 %510 }
  0xbd   : > { %v2451_v32 = vpop.permute.xlu0 %595 }
  0xbe   : > { %v2453_v33 = vpop.permute.xlu1 %600 }
  0xc1   : > { %v516_v34 = vpop.permute.xlu0 %515 }
  0xc2   : > { %v521_v35 = vpop.permute.xlu1 %520 }
  0xc5   : > { %v2455_v36 = vpop.permute.xlu0 %605 }
  0xc6   : > { %v2457_v37 = vpop.permute.xlu1 %610 }
  0xc9   : > { %v526_v38 = vpop.permute.xlu0 %525 }
  0xca   : > { %v531_v39 = vpop.permute.xlu1 %530 }
  0xcd   : > { %v2459_v40 = vpop.permute.xlu0 %615 }
  0xce   : > { %v2461_v41 = vpop.permute.xlu1 %620 }
  0xd1   : > { %v536_v42 = vpop.permute.xlu0 %535 }
  0xd2   : > { %v541_v43 = vpop.permute.xlu1 %540 }
  0xd5   : > { %v2463_v44 = vpop.permute.xlu0 %625 }
  0xd6   : > { %v2465_v45 = vpop.permute.xlu1 %630 }
  0xd9   : > { %v546_v46 = vpop.permute.xlu0 %545 }
  0xda   : > { %v551_v50 = vpop.permute.xlu1 %550 }
  0xdd   : > { %v2467_v58 = vpop.permute.xlu0 %635 }
  0xde   : > { %v2471_v62 = vpop.permute.xlu1 %640 }
  0xe1   : > { %v556_v7 = vpop.permute.xlu0 %555 }
  0xe2   : > { %v561_v12 = vpop.permute.xlu1 %560 }
  0xe5   : > { %v2479_v21 = vpop.permute.xlu0 %645 }
 0x10c   : > { %v1832_v47 = vpop.f32.mrb[0].mxu0 }
 0x10d   : > { %v825_v48 = vadd.f32 %v1832_v47, %v506_v30  ;;  %v816_v49 = vpop.f32.mrb[1].mxu0  ;;  %v2481_v30 = vpop.permute.xlu1 %650 }
 0x10e   : > { %v817_v51 = vadd.f32 %v816_v49, %v496_v24  ;;  %v1833_v52 = vpop.f32.mrb[2].mxu0 }
 0x10f   : > { %v828_v53 = vadd.f32 %v1833_v52, %v511_v31  ;;  %v819_v54 = vpop.f32.mrb[3].mxu0  ;;  %v945_v56 = vmax.f32 %v825_v48, 0.0  ;;  %v566_v48 = vpop.permute.xlu0 %565 }
 0x110   : > { %v820_v55 = vadd.f32 %v819_v54, %v501_v26  ;;  %v943_v59 = vmax.f32 %v817_v51, 0.0 }
 0x111   : > { %v946_v57 = vmax.f32 %v828_v53, 0.0  ;;  %v571_v53 = vpop.permute.xlu1 %570 }
 0x112   : > { %v944_v60 = vmax.f32 %v820_v55, 0.0 }
 0x113   : > { %v2469_v61 = vpack.c.bf16 %v946_v57, %v945_v56 }
 0x114   : > { %v1836_v63 = vpop.f32.mrb[4].mxu0  ;;  %v2473_v0 = vpack.c.bf16 %v944_v60, %v943_v59 }
 0x115   : > { %v841_v1 = vadd.f32 %v1836_v63, %v526_v38  ;;  %v832_v2 = vpop.f32.mrb[5].mxu0 }
 0x116   : > { %v833_v3 = vadd.f32 %v832_v2, %v516_v34  ;;  %v1837_v4 = vpop.f32.mrb[6].mxu0 }
 0x117   : > { %v844_v5 = vadd.f32 %v1837_v4, %v531_v39  ;;  %v835_v6 = vpop.f32.mrb[7].mxu0  ;;  %v949_v9 = vmax.f32 %v841_v1, 0.0 }
 0x118   : > { %v836_v8 = vadd.f32 %v835_v6, %v521_v35  ;;  %v947_v13 = vmax.f32 %v833_v3, 0.0 }
 0x119   : > { %v950_v11 = vmax.f32 %v844_v5, 0.0 }
 0x11a   : > { %v948_v14 = vmax.f32 %v836_v8, 0.0 }
 0x11b   : > { %v2475_v16 = vpack.c.bf16 %v950_v11, %v949_v9 }
 0x11c   : > { %v2477_v17 = vpack.c.bf16 %v948_v14, %v947_v13  ;;  %v1840_v18 = vpop.f32.mrb[8].mxu0 }
 0x11d   : > { %v857_v19 = vadd.f32 %v1840_v18, %v546_v46  ;;  %v848_v20 = vpop.f32.mrb[9].mxu0 }
 0x11e   : > { %v849_v22 = vadd.f32 %v848_v20, %v536_v42  ;;  %v1841_v24 = vpop.f32.mrb[10].mxu0 }
 0x11f   : > { %v860_v26 = vadd.f32 %v1841_v24, %v551_v50  ;;  %v851_v27 = vpop.f32.mrb[11].mxu0  ;;  %v953_v34 = vmax.f32 %v857_v19, 0.0 }
 0x120   : > { %v852_v31 = vadd.f32 %v851_v27, %v541_v43  ;;  %v951_v38 = vmax.f32 %v849_v22, 0.0 }
 0x121   : > { %v954_v35 = vmax.f32 %v860_v26, 0.0 }
 0x122   : > { %v952_v39 = vmax.f32 %v852_v31, 0.0 }
 0x123   : > { %v2483_v47 = vpack.c.bf16 %v954_v35, %v953_v34 }
 0x124   : > { %v2485_v49 = vpack.c.bf16 %v952_v39, %v951_v38  ;;  %v1844_v46 = vpop.f32.mrb[12].mxu0 }
 0x125   : > { %v873_v51 = vadd.f32 %v1844_v46, %v566_v48  ;;  %v864_v52 = vpop.f32.mrb[13].mxu0 }
 0x126   : > { %v865_v42 = vadd.f32 %v864_v52, %v556_v7  ;;  %v1845_v54 = vpop.f32.mrb[14].mxu0 }
 0x127   : > { %v876_v50 = vadd.f32 %v1845_v54, %v571_v53  ;;  %v867_v55 = vpop.f32.mrb[15].mxu0  ;;  %v957_v57 = vmax.f32 %v873_v51, 0.0 }
 0x128   : > { %v868_v56 = vadd.f32 %v867_v55, %v561_v12  ;;  %v955_v59 = vmax.f32 %v865_v42, 0.0 }
 0x129   : > { %v958_v43 = vmax.f32 %v876_v50, 0.0 }
 0x12a   : > { %v956_v60 = vmax.f32 %v868_v56, 0.0 }
 0x12b   : > { %v2487_v63 = vpack.c.bf16 %v958_v43, %v957_v57 }
 0x12c   : > { %v2489_v1 = vpack.c.bf16 %v956_v60, %v955_v59  ;;  %v1848_v2 = vpop.f32.mrb[16].mxu0 }
 0x12d   : > { %v889_v3 = vadd.f32 %v1848_v2, %v2447_v28  ;;  %v880_v4 = vpop.f32.mrb[17].mxu0 }
 0x12e   : > { %v881_v5 = vadd.f32 %v880_v4, %v2440_v23  ;;  %v1849_v6 = vpop.f32.mrb[18].mxu0  ;;  %v1998_v4 = vld [vmem:[%s2603_s3 + $0x40] ss:$8 sps:$4 sm:$0xff]  }
 0x12f   : > { %v892_v7 = vadd.f32 %v1849_v6, %v2449_v29  ;;  %v883_v8 = vpop.f32.mrb[19].mxu0  ;;  %v961_v11 = vmax.f32 %v889_v3, 0.0  ;;  %v1996_v3 = vld [vmem:[%s2603_s3 + $0x44] ss:$8 sps:$4 sm:$0xff]   ;;  %v2001_v6 = vld [vmem:[%s2603_s3 + $0x50] ss:$8 sps:$4 sm:$0xff]  }
 0x130   : > { %v884_v9 = vadd.f32 %v883_v8, %v2442_v25  ;;  %v959_v13 = vmax.f32 %v881_v5, 0.0  ;;  %v1999_v5 = vld [vmem:[%s2603_s3 + $0x54] ss:$8 sps:$4 sm:$0xff]   ;;  %v2004_v8 = vld [vmem:[%s2603_s3 + $0x60] ss:$8 sps:$4 sm:$0xff]  }
 0x131   : > { %v962_v12 = vmax.f32 %v892_v7, 0.0  ;;  %v2002_v7 = vld [vmem:[%s2603_s3 + $0x64] ss:$8 sps:$4 sm:$0xff]  }
 0x132   : > { %v960_v14 = vmax.f32 %v884_v9, 0.0  ;;  %v2005_v9 = vld [vmem:[%s2603_s3 + $0x74] ss:$8 sps:$4 sm:$0xff]  }
 0x133   : > { %v1000_v18 = vpack.c.bf16 %v962_v12, %v961_v11  ;;  %v2007_v11 = vld [vmem:[%s2603_s3 + $0x70] ss:$8 sps:$4 sm:$0xff]   ;;  %v2008_v12 = vld [vmem:[%s2605_s5] sm:$0xff]  }
 0x134   : > { %v1852_v19 = vpop.f32.mrb[20].mxu0  ;;  %v999_v20 = vpack.c.bf16 %v960_v14, %v959_v13  ;;  %1878 = vmatprep.mubr.bf16.mxu0 %v2008_v12 }
 0x135   : > { %v905_v22 = vadd.f32 %v1852_v19, %v2455_v36  ;;  %v896_v24 = vpop.f32.mrb[21].mxu0 }
 0x136   : > { %v897_v28 = vadd.f32 %v896_v24, %v2451_v32  ;;  %v1853_v26 = vpop.f32.mrb[22].mxu0  ;;  %1742 = vmatprep.subr.bf16.mxu1 %v999_v20  ;;  %v1026_v20 = vpop.permute.xlu0 %1025 }
 0x137   : > { %v908_v23 = vadd.f32 %v1853_v26, %v2457_v37  ;;  %v899_v29 = vpop.f32.mrb[23].mxu0  ;;  %1743 = vmatpush3.bf16.msra.mxu1 %v2473_v0  ;;  %v965_v27 = vmax.f32 %v905_v22, 0.0  ;;  %v1031_v26 = vpop.permute.xlu1 %1030 }
 0x138   : > { %v900_v25 = vadd.f32 %v899_v29, %v2453_v33  ;;  %1744 = vmatprep.subr.bf16.mxu1 %v1000_v18  ;;  %v963_v34 = vmax.f32 %v897_v28, 0.0 }
 0x139   : > { %v966_v31 = vmax.f32 %v908_v23, 0.0 }
 0x13a   : > { %v964_v35 = vmax.f32 %v900_v25, 0.0 }
 0x13b   : > { %v1002_v38 = vpack.c.bf16 %v966_v31, %v965_v27  ;;  %1745 = vmatpush3.bf16.msra.mxu1 %v2469_v61 }
 0x13c   : > { %v1001_v36 = vpack.c.bf16 %v964_v35, %v963_v34  ;;  %v1856_v39 = vpop.f32.mrb[24].mxu0 }
 0x13d   : > { %v921_v32 = vadd.f32 %v1856_v39, %v2463_v44  ;;  %v912_v48 = vpop.f32.mrb[25].mxu0 }
 0x13e   : > { %v913_v37 = vadd.f32 %v912_v48, %v2459_v40  ;;  %v1857_v46 = vpop.f32.mrb[26].mxu0  ;;  %1746 = vmatprep.subr.bf16.mxu1 %v1001_v36  ;;  %v1036_v36 = vpop.permute.xlu0 %1035 }
 0x13f   : > { %v924_v0 = vadd.f32 %v1857_v46, %v2465_v45  ;;  %v915_v33 = vpop.f32.mrb[27].mxu0  ;;  %1747 = vmatpush3.bf16.msra.mxu1 %v2477_v17  ;;  %v969_v52 = vmax.f32 %v921_v32, 0.0 }
 0x140   : > { %v916_v51 = vadd.f32 %v915_v33, %v2461_v41  ;;  %1748 = vmatprep.subr.bf16.mxu1 %v1002_v38  ;;  %v967_v61 = vmax.f32 %v913_v37, 0.0  ;;  %v1041_v37 = vpop.permute.xlu1 %1040 }
 0x141   : > { %v970_v53 = vmax.f32 %v924_v0, 0.0 }
 0x142   : > { %v968_v42 = vmax.f32 %v916_v51, 0.0 }
 0x143   : > { %v1004_v54 = vpack.c.bf16 %v970_v53, %v969_v52  ;;  %1749 = vmatpush3.bf16.msra.mxu1 %v2475_v16 }
 0x144   : > { %v1003_v44 = vpack.c.bf16 %v968_v42, %v967_v61  ;;  %v1860_v50 = vpop.f32.mrb[28].mxu0 }
 0x145   : > { %v937_v40 = vadd.f32 %v1860_v50, %v2479_v21  ;;  %v928_v55 = vpop.f32.mrb[29].mxu0 }
 0x146   : > { %v929_v45 = vadd.f32 %v928_v55, %v2467_v58  ;;  %v1861_v56 = vpop.f32.mrb[30].mxu0  ;;  %1750 = vmatprep.subr.bf16.mxu1 %v1003_v44  ;;  %v1984_v58 = vld [vmem:[%s2603_s3] ss:$8 sps:$4 sm:$0xff]   ;;  %v1051_v55 = vpop.permute.xlu1 %1050 }
 0x147   : > { %v940_v17 = vadd.f32 %v1861_v56, %v2481_v30  ;;  %v931_v41 = vpop.f32.mrb[31].mxu0  ;;  %1751 = vmatpush3.bf16.msra.mxu1 %v2485_v49  ;;  %v973_v43 = vmax.f32 %v937_v40, 0.0  ;;  %v1989_v30 = vld [vmem:[%s2603_s3 + $0x10] ss:$8 sps:$4 sm:$0xff]   ;;  %v1992_v49 = vld [vmem:[%s2603_s3 + $0x20] ss:$8 sps:$4 sm:$0xff]  }
 0x148   : > { %v932_v57 = vadd.f32 %v931_v41, %v2471_v62  ;;  %1752 = vmatprep.subr.bf16.mxu1 %v1004_v54  ;;  %v971_v16 = vmax.f32 %v929_v45, 0.0  ;;  %v1987_v62 = vld [vmem:[%s2603_s3 + $0x14] ss:$8 sps:$4 sm:$0xff]   ;;  %v1046_v54 = vpop.permute.xlu0 %1045 }
 0x149   : > { %v974_v59 = vmax.f32 %v940_v17, 0.0 }
 0x14a   : > { %v972_v60 = vmax.f32 %v932_v57, 0.0 }
 0x14b   : > { %v1006_v2 = vpack.c.bf16 %v974_v59, %v973_v43  ;;  %1753 = vmatpush3.bf16.msra.mxu1 %v2483_v47  ;;  %v1990_v47 = vld [vmem:[%s2603_s3 + $0x24] ss:$8 sps:$4 sm:$0xff]  }
 0x14c   : > { %v1005_v21 = vpack.c.bf16 %v972_v60, %v971_v16  ;;  %v1056_v60 = vpop.permute.xlu0 %1055 }
 0x14e   : > { %1754 = vmatprep.subr.bf16.mxu1 %v1005_v21 }
 0x14f   : > { %1755 = vmatpush3.bf16.msra.mxu1 %v2489_v1  ;;  %v1995_v1 = vld [vmem:[%s2603_s3 + $0x30] ss:$8 sps:$4 sm:$0xff]  }
 0x150   : > { %1756 = vmatprep.subr.bf16.mxu1 %v1006_v2 }
 0x153   : > { %1757 = vmatpush3.bf16.msra.mxu1 %v2487_v63  ;;  %v1993_v63 = vld [vmem:[%s2603_s3 + $0x34] ss:$8 sps:$4 sm:$0xff]  }
 0x156   : > { %1216 = vmatmul.mubr.bf16.vlgmr.msra.gmra.mrb[0].mxu1 %v1984_v58 }
 0x157   : > { %1223 = vmatprep.mubr.bf16.mxu1 %v1987_v62  ;;  %v1061_v62 = vpop.permute.xlu1 %1060 }
 0x15e   : > { %1224 = vmatmul.mubr.bf16.gmra.mrb[4].mxu1 %v1989_v30 }
 0x15f   : > { %1231 = vmatprep.mubr.bf16.mxu1 %v1990_v47 }
 0x166   : > { %1232 = vmatmul.mubr.bf16.gmra.mrb[8].mxu1 %v1992_v49 }
 0x167   : > { %1239 = vmatprep.mubr.bf16.mxu1 %v1993_v63 }
 0x16e   : > { %1240 = vmatmul.mubr.bf16.gmra.mrb[12].mxu1 %v1995_v1 }
 0x16f   : > { %1247 = vmatprep.mubr.bf16.mxu1 %v1996_v3 }
 0x176   : > { %1248 = vmatmul.mubr.bf16.gmra.mrb[16].mxu1 %v1998_v4 }
 0x177   : > { %1255 = vmatprep.mubr.bf16.mxu1 %v1999_v5 }
 0x17e   : > { %1256 = vmatmul.mubr.bf16.gmra.mrb[20].mxu1 %v2001_v6  ;;  %v1066_v6 = vpop.permute.xlu0 %1065 }
 0x17f   : > { %1263 = vmatprep.mubr.bf16.mxu1 %v2002_v7 }
 0x186   : > { %1264 = vmatmul.mubr.bf16.gmra.mrb[24].mxu1 %v2004_v8 }
 0x187   : > { %1271 = vmatprep.mubr.bf16.mxu1 %v2005_v9 }
 0x18e   : > { %1272 = vmatmul.mubr.bf16.gmra.mrb[28].mxu1 %v2007_v11  ;;  %v1071_v11 = vpop.permute.xlu1 %1070 }
 0x229   : > { %v1758_v13 = vpop.f32.mrb[0].mxu1 }
 0x22a   : > { %v1759_v14 = vpop.f32.mrb[1].mxu1 }
 0x22b   : > { %v1760_v18 = vadd.f32 %v1759_v14, %v1758_v13  ;;  %v1761_v19 = vpop.f32.mrb[2].mxu1 }
 0x22c   : > { %v1762_v22 = vpop.f32.mrb[3].mxu1 }
 0x22d   : > { %v1218_v24 = vadd.f32 %v1760_v18, %v1026_v20  ;;  %v1763_v28 = vadd.f32 %v1762_v22, %v1761_v19 }
 0x22f   : > { %v1221_v23 = vadd.f32 %v1763_v28, %v1031_v26  ;;  %v1280_v29 = vmax.f32 %v1218_v24, 0.0  ;;  %v1076_v28 = vpop.permute.xlu0 %1075 }
 0x231   : > { %v1281_v25 = vmax.f32 %v1221_v23, 0.0  ;;  %v1764_v27 = vpop.f32.mrb[4].mxu1 }
 0x232   : > { %v1765_v31 = vpop.f32.mrb[5].mxu1 }
 0x233   : > { %v1766_v34 = vadd.f32 %v1765_v31, %v1764_v27  ;;  %v1767_v35 = vpop.f32.mrb[6].mxu1  ;;  %v1304_v38 = vpack.c.bf16 %v1281_v25, %v1280_v29  ;;  %v1081_v25 = vpop.permute.xlu1 %1080 }
 0x234   : > { %v1768_v39 = vpop.f32.mrb[7].mxu1 }
 0x235   : > { %v1226_v32 = vadd.f32 %v1766_v34, %v1036_v36  ;;  %v1769_v48 = vadd.f32 %v1768_v39, %v1767_v35  ;;  %1862 = vmatprep.subr.bf16.mxu0 %v1304_v38 }
 0x236   : > { %1863 = vmatpush3.bf16.msra.mxu0 %v1304_v38 }
 0x237   : > { %v1229_v46 = vadd.f32 %v1769_v48, %v1041_v37  ;;  %v1282_v0 = vmax.f32 %v1226_v32, 0.0  ;;  %v1086_v48 = vpop.permute.xlu0 %1085 }
 0x239   : > { %v1283_v33 = vmax.f32 %v1229_v46, 0.0  ;;  %v1770_v51 = vpop.f32.mrb[8].mxu1 }
 0x23a   : > { %v1771_v52 = vpop.f32.mrb[9].mxu1 }
 0x23b   : > { %v1772_v53 = vadd.f32 %v1771_v52, %v1770_v51  ;;  %v1773_v61 = vpop.f32.mrb[10].mxu1  ;;  %v1305_v42 = vpack.c.bf16 %v1283_v33, %v1282_v0  ;;  %v1091_v33 = vpop.permute.xlu1 %1090 }
 0x23c   : > { %v1774_v44 = vpop.f32.mrb[11].mxu1 }
 0x23d   : > { %v1234_v50 = vadd.f32 %v1772_v53, %v1046_v54  ;;  %v1775_v40 = vadd.f32 %v1774_v44, %v1773_v61  ;;  %1864 = vmatprep.subr.bf16.mxu0 %v1305_v42 }
 0x23e   : > { %1865 = vmatpush3.bf16.msra.mxu0 %v1305_v42 }
 0x23f   : > { %v1237_v45 = vadd.f32 %v1775_v40, %v1051_v55  ;;  %v1284_v56 = vmax.f32 %v1234_v50, 0.0  ;;  %v1096_v40 = vpop.permute.xlu0 %1095 }
 0x241   : > { %v1285_v17 = vmax.f32 %v1237_v45, 0.0  ;;  %v1776_v41 = vpop.f32.mrb[12].mxu1 }
 0x242   : > { %v1777_v57 = vpop.f32.mrb[13].mxu1 }
 0x243   : > { %v1778_v43 = vadd.f32 %v1777_v57, %v1776_v41  ;;  %v1779_v59 = vpop.f32.mrb[14].mxu1  ;;  %v1306_v16 = vpack.c.bf16 %v1285_v17, %v1284_v56  ;;  %v1101_v17 = vpop.permute.xlu1 %1100 }
 0x244   : > { %v1780_v2 = vpop.f32.mrb[15].mxu1 }
 0x245   : > { %v1242_v21 = vadd.f32 %v1778_v43, %v1056_v60  ;;  %v1781_v58 = vadd.f32 %v1780_v2, %v1779_v59  ;;  %1866 = vmatprep.subr.bf16.mxu0 %v1306_v16  ;;  %v2010_v60 = vld [vmem:[%s2605_s5 + $0x10] sm:$0xff]   ;;  %v2011_v2 = vld [vmem:[%s2605_s5 + $0x18] sm:$0xff]  }
 0x246   : > { %1867 = vmatpush3.bf16.msra.mxu0 %v1306_v16  ;;  %v2009_v16 = vld [vmem:[%s2605_s5 + $0x8] sm:$0xff]  }
 0x247   : > { %v1245_v30 = vadd.f32 %v1781_v58, %v1061_v62  ;;  %v1286_v47 = vmax.f32 %v1242_v21, 0.0  ;;  %v2074_v21 = vmov 0.0   ;;  %v1323_v58 = vpop.permute.xlu0 %1322  ;;  %v1328_v62 = vpop.permute.xlu1 %1327 }
 0x248   : > { %1898 = vmatprep.subr.bf16.mxu1 %v2074_v21  ;;  %1902 = vmatprep.mubr.msk.bf16.mxu1 %vm2075_vm2, %v2074_v21 }
 0x249   : > { %v1287_v49 = vmax.f32 %v1245_v30, 0.0  ;;  %v1782_v63 = vpop.f32.mrb[16].mxu1  ;;  %1899 = vmatpush3.bf16.xpose.msra.mxu1 %v2203_v10 }
 0x24a   : > { %v1783_v1 = vpop.f32.mrb[17].mxu1  ;;  %1900 = vmatprep.subr.bf16.mxu1 %v2074_v21 }
 0x24b   : > { %v1784_v3 = vadd.f32 %v1783_v1, %v1782_v63  ;;  %v1785_v4 = vpop.f32.mrb[18].mxu1  ;;  %v1307_v5 = vpack.c.bf16 %v1287_v49, %v1286_v47  ;;  %v1333_v30 = vpop.permute.xlu0 %1332 }
 0x24c   : > { %v1786_v7 = vpop.f32.mrb[19].mxu1  ;;  %v1338_v47 = vpop.permute.xlu1 %1337 }
 0x24d   : > { %v1250_v8 = vadd.f32 %v1784_v3, %v1066_v6  ;;  %v1787_v9 = vadd.f32 %v1786_v7, %v1785_v4  ;;  %1868 = vmatprep.subr.bf16.mxu0 %v1307_v5 }
 0x24e   : > { %1869 = vmatpush3.bf16.msra.mxu0 %v1307_v5 }
 0x24f   : > { %v1253_v12 = vadd.f32 %v1787_v9, %v1071_v11  ;;  %v1288_v13 = vmax.f32 %v1250_v8, 0.0  ;;  %v1343_v3 = vpop.permute.xlu0 %1342 }
 0x250   : > { %v1348_v8 = vpop.permute.xlu1 %1347 }
 0x251   : > { %v1289_v14 = vmax.f32 %v1253_v12, 0.0  ;;  %v1788_v18 = vpop.f32.mrb[20].mxu1  ;;  %1901 = vmatpush3.bf16.xpose.msra.mxu1 %v2211_v15 }
 0x252   : > { %v1789_v19 = vpop.f32.mrb[21].mxu1 }
 0x253   : > { %v1790_v20 = vadd.f32 %v1789_v19, %v1788_v18  ;;  %v1791_v22 = vpop.f32.mrb[22].mxu1  ;;  %v1308_v24 = vpack.c.bf16 %v1289_v14, %v1288_v13  ;;  %v1353_v14 = vpop.permute.xlu0 %1352 }
 0x254   : > { %v1792_v26 = vpop.f32.mrb[23].mxu1 }
 0x255   : > { %v1258_v23 = vadd.f32 %v1790_v20, %v1076_v28  ;;  %v1793_v29 = vadd.f32 %v1792_v26, %v1791_v22  ;;  %1870 = vmatprep.subr.bf16.mxu0 %v1308_v24 }
 0x256   : > { %1871 = vmatpush3.bf16.msra.mxu0 %v1308_v24  ;;  %v1358_v24 = vpop.permute.xlu1 %1357 }
 0x257   : > { %v1261_v27 = vadd.f32 %v1793_v29, %v1081_v25  ;;  %v1290_v31 = vmax.f32 %v1258_v23, 0.0 }
 0x259   : > { %v1291_v34 = vmax.f32 %v1261_v27, 0.0  ;;  %v1794_v35 = vpop.f32.mrb[24].mxu1 }
 0x25a   : > { %v1795_v38 = vpop.f32.mrb[25].mxu1 }
 0x25b   : > { %v1796_v36 = vadd.f32 %v1795_v38, %v1794_v35  ;;  %v1797_v39 = vpop.f32.mrb[26].mxu1  ;;  %v1309_v32 = vpack.c.bf16 %v1291_v34, %v1290_v31 }
 0x25c   : > { %v1798_v37 = vpop.f32.mrb[27].mxu1 }
 0x25d   : > { %v1266_v46 = vadd.f32 %v1796_v36, %v1086_v48  ;;  %v1799_v0 = vadd.f32 %v1798_v37, %v1797_v39  ;;  %1872 = vmatprep.subr.bf16.mxu0 %v1309_v32  ;;  %v1457_v39 = vld [vmem:[%s2607_s7] sm:$0x3] }
 0x25e   : > { %1873 = vmatpush3.bf16.msra.mxu0 %v1309_v32  ;;  %v1466_v32 = vpop.permute.xlu0 %1465 }
 0x25f   : > { %v1269_v51 = vadd.f32 %v1799_v0, %v1091_v33  ;;  %v1292_v52 = vmax.f32 %v1266_v46, 0.0 }
 0x261   : > { %v1293_v53 = vmax.f32 %v1269_v51, 0.0  ;;  %v1800_v61 = vpop.f32.mrb[28].mxu1 }
 0x262   : > { %v1801_v42 = vpop.f32.mrb[29].mxu1 }
 0x263   : > { %v1802_v54 = vadd.f32 %v1801_v42, %v1800_v61  ;;  %v1803_v44 = vpop.f32.mrb[30].mxu1  ;;  %v1310_v50 = vpack.c.bf16 %v1293_v53, %v1292_v52 }
 0x264   : > { %v1804_v55 = vpop.f32.mrb[31].mxu1 }
 0x265   : > { %v1274_v45 = vadd.f32 %v1802_v54, %v1096_v40  ;;  %v1805_v56 = vadd.f32 %v1804_v55, %v1803_v44  ;;  %1874 = vmatprep.subr.bf16.mxu0 %v1310_v50  ;;  %v1518_v54 = vld [vmem:[#allocation2] sm:$0xf] }
 0x266   : > { %1875 = vmatpush3.bf16.msra.mxu0 %v1310_v50 }
 0x267   : > { %v1277_v41 = vadd.f32 %v1805_v56, %v1101_v17  ;;  %v1294_v57 = vmax.f32 %v1274_v45, 0.0 }
 0x269   : > { %v1295_v43 = vmax.f32 %v1277_v41, 0.0 }
 0x26b   : > { %v1311_v59 = vpack.c.bf16 %v1295_v43, %v1294_v57 }
 0x26d   : > { %1876 = vmatprep.subr.bf16.mxu0 %v1311_v59 }
 0x26e   : > { %1877 = vmatpush3.bf16.msra.mxu0 %v1311_v59 }
 0x26f   : > { %1886 = vmatprep.subr.bf16.mxu0 %v2074_v21 }
 0x271   : > { %1879 = vmatmul.mubr.bf16.vlgmr.msra.gmra.mrb[32].mxu0 %v2009_v16 }
 0x272   : > { %1882 = vmatprep.mubr.bf16.mxu0 %v2010_v60 }
 0x279   : > { %1883 = vmatmul.mubr.bf16.gmra.mrb[36].mxu0 %v2011_v2 }
 0x27a   : > { %1894 = vmatprep.mubr.msk.bf16.mxu0 %vm2075_vm2, %v2074_v21 }
 0x344   : > { %v1880_v49 = vpop.f32.mrb[32].mxu0 }
 0x345   : > { %v1427_v63 = vadd.f32 %v1880_v49, %v1333_v30  ;;  %v1418_v1 = vpop.f32.mrb[33].mxu0 }
 0x346   : > { %v1419_v4 = vadd.f32 %v1418_v1, %v1323_v58  ;;  %v1881_v5 = vpop.f32.mrb[34].mxu0 }
 0x347   : > { %v1430_v6 = vadd.f32 %v1881_v5, %v1338_v47  ;;  %v1421_v7 = vpop.f32.mrb[35].mxu0  ;;  %v1451_v9 = vmax.f32 %v1427_v63, 0.0 }
 0x348   : > { %v1422_v10 = vadd.f32 %v1421_v7, %v1328_v62  ;;  %v1449_v15 = vmax.f32 %v1419_v4, 0.0 }
 0x349   : > { %v1452_v11 = vmax.f32 %v1430_v6, 0.0 }
 0x34a   : > { %v1450_v12 = vmax.f32 %v1422_v10, 0.0 }
 0x34b   : > { %v1459_v13 = vpack.c.bf16 %v1452_v11, %v1451_v9 }
 0x34c   : > { %v1458_v18 = vpack.c.bf16 %v1450_v12, %v1449_v15  ;;  %v1884_v19 = vpop.f32.mrb[36].mxu0 }
 0x34d   : > { %v1443_v20 = vadd.f32 %v1884_v19, %v1353_v14  ;;  %v1434_v22 = vpop.f32.mrb[37].mxu0 }
 0x34e   : > { %v1435_v28 = vadd.f32 %v1434_v22, %v1343_v3  ;;  %v1885_v26 = vpop.f32.mrb[38].mxu0  ;;  %1887 = vmatpush3.bf16.msra.mxu0 %v1458_v18 }
 0x34f   : > { %v1446_v23 = vadd.f32 %v1885_v26, %v1358_v24  ;;  %v1437_v29 = vpop.f32.mrb[39].mxu0  ;;  %1888 = vmatprep.subr.bf16.mxu0 %v2074_v21  ;;  %v1455_v27 = vmax.f32 %v1443_v20, 0.0 }
 0x350   : > { %v1438_v25 = vadd.f32 %v1437_v29, %v1348_v8  ;;  %v1453_v34 = vmax.f32 %v1435_v28, 0.0 }
 0x351   : > { %v1456_v31 = vmax.f32 %v1446_v23, 0.0 }
 0x352   : > { %v1454_v35 = vmax.f32 %v1438_v25, 0.0  ;;  %1889 = vmatpush3.bf16.msra.mxu0 %v1459_v13 }
 0x353   : > { %v1461_v38 = vpack.c.bf16 %v1456_v31, %v1455_v27  ;;  %1890 = vmatprep.subr.bf16.mxu0 %v2074_v21 }
 0x354   : > { %v1460_v36 = vpack.c.bf16 %v1454_v35, %v1453_v34 }
 0x356   : > { %1891 = vmatpush3.bf16.msra.mxu0 %v1460_v36 }
 0x357   : > { %1892 = vmatprep.subr.bf16.mxu0 %v2074_v21 }
 0x35a   : > { %1893 = vmatpush3.bf16.msra.mxu0 %v1461_v38 }
 0x35d   : > { %1895 = vmatmul.mubr.msk.bf16.vlgmr.msra.gmra.mrb[40].mxu0 %vm1468_vm3, %v1457_v39 }
 0x430   : > { %v1506_v48 = vpop.f32.mrb[40].mxu0 }
 0x431   : > { %v1507_v37 = vadd.f32 %v1506_v48, %v1466_v32  ;;  %v1896_v46 = vpop.f32.mrb[41].mxu0 }
 0x432   : > { %v1509_v0 = vpop.f32.mrb[42].mxu0 }
 0x433   : > { %v1720_v33 = vmul.f32 -1.442695, %v1507_v37  ;;  %v1897_v51 = vpop.f32.mrb[43].mxu0 }
 0x435   : > { %2012 = vpow2.f32 %v1720_v33 }
 0x43f   : > { %v2013_v52 = vpop.eup %2012 }
 0x440   : > { %v1515_v53 = vadd.f32 1.0, %v2013_v52 }
 0x442   : > { %2014 = vrcp.f32 %v1515_v53 }
 0x44c   : > { %v2015_v61 = vpop.eup %2014 }
 0x44d   : > { %v1519_v42 = vpack.c.bf16 %v2015_v61, %v2015_v61 }
 0x44f   : > { %1903 = vmatmul.mubr.bf16.vlgmr.msra.gmra.mrb[32].mxu1 %v1519_v42 }
 0x51f   : > { %1566 = sbr.rel (%p1721_p12) target bundleno = 1326 (0x52e), region = 102 }
 0x522   : > { %v1554_v44 = vpop.f32.mrb[32].mxu1 }
 0x523   : > { %v1560_v50 = vadd.f32 %v1554_v44, %v1518_v54  ;;  %v1904_v40 = vpop.f32.mrb[33].mxu1 }
 0x524   : > { %v1557_v55 = vpop.f32.mrb[34].mxu1 }
 0x525   : > { %1562 = vst.msk [vmem:[#allocation2] sm:$0xf] %vm1561_vm4, %v1560_v50  ;;  %v1905_v45 = vpop.f32.mrb[35].mxu1 }
 0x52c   : > { %v1567_v56 = vld [vmem:[#allocation2] sm:$0xf] }
 0x52d   : > { %1568 = vst.msk [vmem:[%s2194_s26] sm:$0xf] %vm1561_vm4, %v1567_v56 }
 0x52e PF: > { %s19_s15 = sadd.s32 1, %s2070_s15   ;;  %s2610_s30 = smov %s2050_s10 }
 0x52f   : > { %p16_p13 = scmp.ge.s32.totalorder %s19_s15, 6   ;;  %s2611_s10 = smov %s2177_s22 }
 0x530   : > { %s2612_s11 = smov %s2062_s13  ;;  %s2613_s12 = smov %s2066_s14 }
 0x531   : > { %s2614_s13 = smov %s2617_s16  ;;  %s2615_s14 = smov %s2621_s17 }
 0x532   :  { %18 = sbr.rel (!%p16_p13) target bundleno = 4 (0x4), region = 137 }

</bundles_post_ra>
